<compile_context>
chip_gen: v7x
topology: tpu7x:2x2x1
jax: 0.10.0
libtpu: 0.0.40
codegen_flags: <defaults>
</compile_context>

<pallas_src>
import numpy as np
import jax
import jax.numpy as jnp
from jax.experimental import pallas as pl
from jax.experimental.pallas import tpu as pltpu


# ----------------------------------------------------------------------------
# helpers
# ----------------------------------------------------------------------------
def _round_up(x, m):
    return ((x + m - 1) // m) * m


def _branch_geometry(total, length, k):
    if total % length != 0:
        nums = total // length + 1
        pad = nums * length - total
    else:
        nums = total // length
        pad = 0
    P = nums * (k - 1) // 2                       # PyTorch Conv1d zero padding (both sides)
    Lz = nums * length + 2 * P                    # replication-padded + zero-padded length
    L1 = Lz - nums * (k - 1)                      # conv1 output length
    Lout = (L1 - nums) // nums + 1                # conv2 output length (== length)
    return nums, pad, P, Lz, L1, Lout


_TB_CAP = 256                                     # batch-tile cap (lane axis)


def _pick_tb(b128):
    """Largest 128-multiple tile <= _TB_CAP that divides b128; keeps grid >= 2 whenever
    b128 >= 256 so both TensorCores on v7x get work (megacore sharding on v5e/v6e too)."""
    if b128 <= 128:
        return 128
    cap = min(_TB_CAP, b128 // 2)
    cap -= cap % 128
    for tb in range(cap, 127, -128):
        if b128 % tb == 0:
            return tb
    return 128


# ----------------------------------------------------------------------------
# Pallas kernel factory: all branches fused, batch on lanes everywhere
# ----------------------------------------------------------------------------
def _make_kernel(geoms, k, cs_offs, row_offs, total, total_pad, nh_pad, nout):
    """Ref layout: xslab, cs(SMEM), W1^T, W2^T, vecs, out."""
    n_branch = len(geoms)
    inv_n = 1.0 / float(total)

    def kernel(xs_ref, cs_ref, w1t_ref, w2t_ref, vec_ref, out_ref):
        tb = out_ref.shape[1]                     # batch tile = lane width everywhere

        # ---- conv stage: per-branch, per-phase shifted VPU MACs (batch on lanes) ------
        y2_blocks = []
        for i, (length, nums, lk) in enumerate(geoms):
            co, ro = cs_offs[i], row_offs[i]
            b1 = cs_ref[co + k + nums]
            b2 = cs_ref[co + k + nums + 1]
            acc2 = None
            for r in range(nums):                 # phase r of the dilated / strided convs
                base = ro + r * lk
                acc1 = cs_ref[co] * xs_ref[base:base + length, :]
                for j in range(1, k):
                    acc1 = acc1 + cs_ref[co + j] * xs_ref[base + j:base + j + length, :]
                term = cs_ref[co + k + r] * jnp.tanh(acc1 + b1)
                acc2 = term if acc2 is None else acc2 + term
            y2 = jnp.tanh(acc2 + b2)                              # (length, tb) f32
            l8 = _round_up(length, 8)
            if l8 > length:                                        # 8-align each branch block
                y2 = jnp.concatenate(
                    [y2, jnp.zeros((l8 - length, tb), jnp.float32)], axis=0)
            y2_blocks.append(y2)
        y2cat = y2_blocks[0] if n_branch == 1 else jnp.concatenate(y2_blocks, axis=0)

        # ---- fused block-diagonal MLP: two plain MXU matmuls cover every branch --------
        mb1 = vec_ref[0:nh_pad, 0:1]              # column vectors, broadcast over lanes
        mb2 = vec_ref[0:nout, 1:2]
        gam = vec_ref[0:total_pad, 2:3]
        bet = vec_ref[0:total_pad, 3:4]
        h = jnp.dot(w1t_ref[...], y2cat.astype(jnp.bfloat16),
                    preferred_element_type=jnp.float32) + mb1     # (nh_pad, tb)
        h = jnp.maximum(h, 0.01 * h)                              # LeakyReLU(0.01)
        o = jnp.dot(w2t_ref[...], h.astype(jnp.bfloat16),
                    preferred_element_type=jnp.float32) + mb2     # (nout, tb)

        # ---- LayerNorm per branch block (eps=1e-5, biased variance, affine) ------------
        row = jax.lax.broadcasted_iota(jnp.int32, (total_pad, 1), 0)
        valid = row < total
        for i in range(n_branch):
            oi = o[i * total_pad:(i + 1) * total_pad, :]
            mu = jnp.sum(oi, axis=0, keepdims=True) * inv_n       # padded rows of o are 0
            d = jnp.where(valid, oi - mu, 0.0)
            var = jnp.sum(d * d, axis=0, keepdims=True) * inv_n
            out_ref[i * total_pad:(i + 1) * total_pad, :] = (
                d * jax.lax.rsqrt(var + 1e-5) * gam + bet)        # full-lane unmasked store

    return kernel


# ----------------------------------------------------------------------------
# Parameters
# ----------------------------------------------------------------------------
def init_params(key, cfg):
    total = cfg.seq_len + cfg.pred_len
    branches = []
    for length in cfg.sample_len:
        nums, _, _, _, _, _ = _branch_geometry(total, length, cfg.k)
        key, *ks = jax.random.split(key, 9)
        branches.append(dict(
            conv1_w=0.3 * jax.random.normal(ks[0], (cfg.k,), jnp.float32),
            conv1_b=0.1 * jax.random.normal(ks[1], (), jnp.float32),
            conv2_w=0.3 * jax.random.normal(ks[2], (nums,), jnp.float32),
            conv2_b=0.1 * jax.random.normal(ks[3], (), jnp.float32),
            mlp_w1=0.3 * jax.random.normal(ks[4], (length, cfg.d_hid), jnp.float32),
            mlp_b1=0.1 * jax.random.normal(ks[5], (cfg.d_hid,), jnp.float32),
            mlp_w2=0.3 * jax.random.normal(ks[6], (cfg.d_hid, total), jnp.float32),
            mlp_b2=0.1 * jax.random.normal(ks[7], (total,), jnp.float32),
        ))
    return dict(branches=branches,
                ln_gamma=jnp.ones((total,), jnp.float32),
                ln_beta=jnp.zeros((total,), jnp.float32))


# ----------------------------------------------------------------------------
# Forward wrapper (jit-compatible; no numpy on traced values)
# ----------------------------------------------------------------------------
def contextual_sampling_multi(x_enc, x_dec, params, cfg):
    """Returns a list of (B, 1, seq_len+pred_len) arrays, one per sample_len branch."""
    total = cfg.seq_len + cfg.pred_len
    k = cfg.k
    d_hid = cfg.d_hid
    n_branch = len(cfg.sample_len)
    total_pad = _round_up(total, 128)
    nout = n_branch * total_pad
    nh = n_branch * d_hid
    nh_pad = _round_up(nh, 128)
    vw = max(nh_pad, nout)

    B = x_enc.shape[0]
    b128 = _round_up(B, 128)                     # batch is the lane axis now
    tb = _pick_tb(b128)
    b_pad = _round_up(b128, tb)
    grid = (b_pad // tb,)

    xcat = jnp.concatenate([x_enc[:, 0, :], x_dec[:, 0, :]], axis=-1).astype(jnp.float32)

    geoms, cs_offs, row_offs, sub_offs = [], [0], [0], [0]
    slab_rows, cs_vals, mb1_parts, mb2_parts = [], [], [], []
    for i, length in enumerate(cfg.sample_len):
        p = params["branches"][i]
        nums, pad, P, Lz, L1, Lout = _branch_geometry(total, length, k)
        if L1 != nums * length or Lout != length:
            # The PyTorch module itself requires Lout == length (Linear input dim); odd k.
            raise NotImplementedError("phase decomposition requires odd k (Lout == length)")
        lk = length + k - 1

        # ReplicationPad1d((0, pad)) + Conv1d zero padding, phase-major, batch last (lanes)
        xp = xcat
        if pad > 0:
            xp = jnp.concatenate([xp, jnp.repeat(xp[:, -1:], pad, axis=1)], axis=1)
        xz = jnp.pad(xp, ((0, 0), (P, P)))                        # (B, Lz)
        ph = xz.reshape(B, lk, nums).transpose(2, 1, 0)           # (nums, lk, B): phase r = xz[:, r::nums]
        slab_rows.append(ph.reshape(nums * lk, B))

        # conv taps + biases packed into one SMEM scalar vector (all branches)
        cs_vals += [p["conv1_w"].reshape(-1).astype(jnp.float32),
                    p["conv2_w"].reshape(-1).astype(jnp.float32),
                    p["conv1_b"].reshape(1).astype(jnp.float32),
                    p["conv2_b"].reshape(1).astype(jnp.float32)]
        mb1_parts.append(p["mlp_b1"].astype(jnp.float32))
        mb2_parts.append(jnp.pad(p["mlp_b2"].astype(jnp.float32), (0, total_pad - total)))

        geoms.append((length, nums, lk))
        cs_offs.append(cs_offs[-1] + k + nums + 2)
        row_offs.append(row_offs[-1] + nums * lk)
        sub_offs.append(sub_offs[-1] + _round_up(length, 8))

    # packed phase-major input slab (rows: branch-major, phase-major; cols: batch)
    r_tot = row_offs[-1]
    r8 = _round_up(r_tot, 8)
    xslab = jnp.concatenate(slab_rows, axis=0)                    # (r_tot, B)
    xslab = jnp.pad(xslab, ((0, r8 - r_tot), (0, b_pad - B)))     # (r8, b_pad)
    cs = jnp.concatenate(cs_vals)

    # transposed block-diagonal MLP weights (bf16 MXU operands)
    suml8 = sub_offs[-1]
    w1t = jnp.concatenate(
        [jnp.pad(params["branches"][i]["mlp_w1"].T.astype(jnp.float32),
                 ((0, 0), (sub_offs[i], suml8 - sub_offs[i] - cfg.sample_len[i])))
         for i in range(n_branch)], axis=0)                       # (nh, suml8)
    w1t = jnp.pad(w1t, ((0, nh_pad - nh), (0, 0))).astype(jnp.bfloat16)
    w2t = jnp.concatenate(
        [jnp.pad(params["branches"][i]["mlp_w2"].T.astype(jnp.float32),
                 ((0, total_pad - total), (i * d_hid, nh_pad - (i + 1) * d_hid)))
         for i in range(n_branch)], axis=0).astype(jnp.bfloat16)  # (nout, nh_pad)

    # packed column vectors: mlp biases + LayerNorm gamma/beta
    mb1_col = jnp.pad(jnp.concatenate(mb1_parts), (0, vw - nh))
    mb2_col = jnp.pad(jnp.concatenate(mb2_parts), (0, vw - nout))
    gam_col = jnp.pad(params["ln_gamma"].astype(jnp.float32), (0, vw - total))
    bet_col = jnp.pad(params["ln_beta"].astype(jnp.float32), (0, vw - total))
    vecs = jnp.pad(jnp.stack([mb1_col, mb2_col, gam_col, bet_col], axis=1),
                   ((0, 0), (0, 4)))                              # (vw, 8)

    kernel = _make_kernel(tuple(geoms), k, tuple(cs_offs), tuple(row_offs),
                          total, total_pad, nh_pad, nout)

    out = pl.pallas_call(
        kernel,
        out_shape=jax.ShapeDtypeStruct((nout, b_pad), jnp.float32),
        grid=grid,
        in_specs=[
            pl.BlockSpec((r8, tb), lambda b: (0, b)),             # batch-tiled phase slab
            pl.BlockSpec(memory_space=pltpu.MemorySpace.SMEM),    # packed conv scalars
            pl.BlockSpec((nh_pad, suml8), lambda b: (0, 0)),      # resident block-diag W1^T
            pl.BlockSpec((nout, nh_pad), lambda b: (0, 0)),       # resident block-diag W2^T
            pl.BlockSpec((vw, 8), lambda b: (0, 0)),              # packed biases / gamma / beta
        ],
        out_specs=pl.BlockSpec((nout, tb), lambda b: (0, b)),
        compiler_params=pltpu.CompilerParams(dimension_semantics=("parallel",)),
    )(xslab, cs, w1t, w2t, vecs)

    # padded batch columns / padded feature rows are garbage-by-construction -> sliced off
    return [jnp.transpose(out[i * total_pad:i * total_pad + total, :B])[:, None, :]
            for i in range(n_branch)]


# ----------------------------------------------------------------------------
# Pure numpy reference (direct conv loops, bf16-mirrored MLP) for verification
# ----------------------------------------------------------------------------
def _bf16_round(a):
    """Round-to-nearest-even bf16 quantization (matches the kernel's astype)."""
    return np.asarray(jnp.asarray(np.asarray(a, np.float32)).astype(jnp.bfloat16).astype(jnp.float32))


def reference(x_enc, x_dec, params, cfg):
    total = cfg.seq_len + cfg.pred_len
    B = x_enc.shape[0]
    xcat = np.concatenate([x_enc[:, 0, :], x_dec[:, 0, :]], axis=-1).astype(np.float32)
    gamma = np.asarray(params["ln_gamma"])
    beta = np.asarray(params["ln_beta"])
    outs = []
    for i, length in enumerate(cfg.sample_len):
        p = params["branches"][i]
        nums, pad, P, Lz, L1, Lout = _branch_geometry(total, length, cfg.k)
        xp = np.concatenate([xcat, np.repeat(xcat[:, -1:], pad, axis=1)], axis=1) if pad else xcat
        xz = np.pad(xp, ((0, 0), (P, P)))
        w1 = np.asarray(p["conv1_w"]); b1 = float(p["conv1_b"])
        y1 = np.zeros((B, L1), np.float32)
        for t in range(L1):
            s = np.full(B, b1, np.float32)
            for j in range(cfg.k):
                s = s + w1[j] * xz[:, t + j * nums]
            y1[:, t] = s
        y1 = np.tanh(y1)
        w2 = np.asarray(p["conv2_w"]); b2 = float(p["conv2_b"])
        y2 = np.zeros((B, Lout), np.float32)
        for t in range(Lout):
            s = np.full(B, b2, np.float32)
            for j in range(nums):
                s = s + w2[j] * y1[:, t * nums + j]
            y2[:, t] = s
        y2 = np.tanh(y2)
        # MLP mirrored in bf16 (kernel feeds bf16 to the MXU, accumulates in f32)
        h = _bf16_round(y2) @ _bf16_round(p["mlp_w1"]) + np.asarray(p["mlp_b1"])
        h = np.where(h > 0, h, 0.01 * h).astype(np.float32)
        o = _bf16_round(h) @ _bf16_round(p["mlp_w2"]) + np.asarray(p["mlp_b2"])
        mu = o.mean(-1, keepdims=True)
        var = ((o - mu) ** 2).mean(-1, keepdims=True)
        out = (o - mu) / np.sqrt(var + 1e-5) * gamma + beta
        outs.append(out[:, None, :].astype(np.float32))
    return outs


# ----------------------------------------------------------------------------
if __name__ == "__main__":
    class Cfg:
        pass

    cfg = Cfg()
    cfg.seq_len = 8
    cfg.pred_len = 8
    cfg.sample_len = [4, 6]   # branch 0: nums=4, pad=0 ; branch 1: nums=3, pad=2
    cfg.k = 3
    cfg.d_hid = 32

    B = 2
    key = jax.random.PRNGKey(0)
    k_enc, k_dec, k_par = jax.random.split(key, 3)
    x_enc = jax.random.normal(k_enc, (B, 1, cfg.seq_len), jnp.float32)
    x_dec = jax.random.normal(k_dec, (B, 1, cfg.pred_len), jnp.float32)

    params = init_params(k_par, cfg)

    fwd = jax.jit(lambda xe, xd, p: contextual_sampling_multi(xe, xd, p, cfg))
    outs = fwd(x_enc, x_dec, params)
    outs = [jax.block_until_ready(o) for o in outs]

    refs = reference(np.asarray(x_enc), np.asarray(x_dec), params, cfg)
    for o, r in zip(outs, refs):
        # bf16 MXU path mirrored via bf16 quantization in the reference; remaining slack
        # covers EUP-tanh vs numpy tanh and accumulation-order differences.
        np.testing.assert_allclose(np.asarray(o), r, rtol=1e-2, atol=1e-2)

    print("KERNEL_OK")
</pallas_src>

<mosaic_0001>
module attributes {stable_mosaic.version = 11 : i64} {
  func.func @kernel(%arg0: i32, %arg1: memref<48x128xf32, #tpu.memory_space<vmem>>, %arg2: memref<17xf32, #tpu.memory_space<smem>>, %arg3: memref<128x16xbf16, #tpu.memory_space<vmem>>, %arg4: memref<256x128xbf16, #tpu.memory_space<vmem>>, %arg5: memref<256x8xf32, #tpu.memory_space<vmem>>, %arg6: memref<256x128xf32, #tpu.memory_space<vmem>>) attributes {dimension_semantics = [#tpu.dimension_semantics<parallel>], iteration_bounds = array<i64: 1>, scalar_prefetch = 0 : i64, scratch_operands = 0 : i64, tpu.core_type = #tpu.core_type<tc>, window_params = [{transform_indices = @transform_0, window_bounds = array<i64: 48, 128>}, {transform_indices = @transform_1, window_bounds = array<i64: 17>}, {pipeline_mode = #tpu.pipeline_mode<synchronous>, transform_indices = @transform_2, window_bounds = array<i64: 128, 16>}, {pipeline_mode = #tpu.pipeline_mode<synchronous>, transform_indices = @transform_3, window_bounds = array<i64: 256, 128>}, {pipeline_mode = #tpu.pipeline_mode<synchronous>, transform_indices = @transform_4, window_bounds = array<i64: 256, 8>}, {transform_indices = @transform_5, window_bounds = array<i64: 256, 128>}]} {
    %c7 = arith.constant 7 : index
    %0 = memref.load %arg2[%c7] : memref<17xf32, #tpu.memory_space<smem>>
    %c8 = arith.constant 8 : index
    %1 = memref.load %arg2[%c8] : memref<17xf32, #tpu.memory_space<smem>>
    %c0 = arith.constant 0 : index
    %2 = memref.load %arg2[%c0] : memref<17xf32, #tpu.memory_space<smem>>
    %c0_0 = arith.constant 0 : index
    %c0_1 = arith.constant 0 : index
    %3 = vector.load %arg1[%c0_0, %c0_1] : memref<48x128xf32, #tpu.memory_space<vmem>>, vector<4x128xf32>
    %4 = vector.broadcast %2 : f32 to vector<4x128xf32>
    %5 = arith.mulf %4, %3 : vector<4x128xf32>
    %c1 = arith.constant 1 : index
    %6 = memref.load %arg2[%c1] : memref<17xf32, #tpu.memory_space<smem>>
    %c1_2 = arith.constant 1 : index
    %c0_3 = arith.constant 0 : index
    %7 = vector.load %arg1[%c1_2, %c0_3] : memref<48x128xf32, #tpu.memory_space<vmem>>, vector<4x128xf32>
    %8 = vector.broadcast %6 : f32 to vector<4x128xf32>
    %9 = arith.mulf %8, %7 : vector<4x128xf32>
    %10 = arith.addf %5, %9 : vector<4x128xf32>
    %c2 = arith.constant 2 : index
    %11 = memref.load %arg2[%c2] : memref<17xf32, #tpu.memory_space<smem>>
    %c2_4 = arith.constant 2 : index
    %c0_5 = arith.constant 0 : index
    %12 = vector.load %arg1[%c2_4, %c0_5] : memref<48x128xf32, #tpu.memory_space<vmem>>, vector<4x128xf32>
    %13 = vector.broadcast %11 : f32 to vector<4x128xf32>
    %14 = arith.mulf %13, %12 : vector<4x128xf32>
    %15 = arith.addf %10, %14 : vector<4x128xf32>
    %c3 = arith.constant 3 : index
    %16 = memref.load %arg2[%c3] : memref<17xf32, #tpu.memory_space<smem>>
    %17 = vector.broadcast %0 : f32 to vector<4x128xf32>
    %18 = arith.addf %15, %17 : vector<4x128xf32>
    %19 = math.tanh %18 : vector<4x128xf32>
    %20 = vector.broadcast %16 : f32 to vector<4x128xf32>
    %21 = arith.mulf %20, %19 : vector<4x128xf32>
    %c0_6 = arith.constant 0 : index
    %22 = memref.load %arg2[%c0_6] : memref<17xf32, #tpu.memory_space<smem>>
    %c6 = arith.constant 6 : index
    %c0_7 = arith.constant 0 : index
    %23 = vector.load %arg1[%c6, %c0_7] : memref<48x128xf32, #tpu.memory_space<vmem>>, vector<4x128xf32>
    %24 = vector.broadcast %22 : f32 to vector<4x128xf32>
    %25 = arith.mulf %24, %23 : vector<4x128xf32>
    %c1_8 = arith.constant 1 : index
    %26 = memref.load %arg2[%c1_8] : memref<17xf32, #tpu.memory_space<smem>>
    %c7_9 = arith.constant 7 : index
    %c0_10 = arith.constant 0 : index
    %27 = vector.load %arg1[%c7_9, %c0_10] : memref<48x128xf32, #tpu.memory_space<vmem>>, vector<4x128xf32>
    %28 = vector.broadcast %26 : f32 to vector<4x128xf32>
    %29 = arith.mulf %28, %27 : vector<4x128xf32>
    %30 = arith.addf %25, %29 : vector<4x128xf32>
    %c2_11 = arith.constant 2 : index
    %31 = memref.load %arg2[%c2_11] : memref<17xf32, #tpu.memory_space<smem>>
    %c8_12 = arith.constant 8 : index
    %c0_13 = arith.constant 0 : index
    %32 = vector.load %arg1[%c8_12, %c0_13] : memref<48x128xf32, #tpu.memory_space<vmem>>, vector<4x128xf32>
    %33 = vector.broadcast %31 : f32 to vector<4x128xf32>
    %34 = arith.mulf %33, %32 : vector<4x128xf32>
    %35 = arith.addf %30, %34 : vector<4x128xf32>
    %c4 = arith.constant 4 : index
    %36 = memref.load %arg2[%c4] : memref<17xf32, #tpu.memory_space<smem>>
    %37 = vector.broadcast %0 : f32 to vector<4x128xf32>
    %38 = arith.addf %35, %37 : vector<4x128xf32>
    %39 = math.tanh %38 : vector<4x128xf32>
    %40 = vector.broadcast %36 : f32 to vector<4x128xf32>
    %41 = arith.mulf %40, %39 : vector<4x128xf32>
    %42 = arith.addf %21, %41 : vector<4x128xf32>
    %c0_14 = arith.constant 0 : index
    %43 = memref.load %arg2[%c0_14] : memref<17xf32, #tpu.memory_space<smem>>
    %c12 = arith.constant 12 : index
    %c0_15 = arith.constant 0 : index
    %44 = vector.load %arg1[%c12, %c0_15] : memref<48x128xf32, #tpu.memory_space<vmem>>, vector<4x128xf32>
    %45 = vector.broadcast %43 : f32 to vector<4x128xf32>
    %46 = arith.mulf %45, %44 : vector<4x128xf32>
    %c1_16 = arith.constant 1 : index
    %47 = memref.load %arg2[%c1_16] : memref<17xf32, #tpu.memory_space<smem>>
    %c13 = arith.constant 13 : index
    %c0_17 = arith.constant 0 : index
    %48 = vector.load %arg1[%c13, %c0_17] : memref<48x128xf32, #tpu.memory_space<vmem>>, vector<4x128xf32>
    %49 = vector.broadcast %47 : f32 to vector<4x128xf32>
    %50 = arith.mulf %49, %48 : vector<4x128xf32>
    %51 = arith.addf %46, %50 : vector<4x128xf32>
    %c2_18 = arith.constant 2 : index
    %52 = memref.load %arg2[%c2_18] : memref<17xf32, #tpu.memory_space<smem>>
    %c14 = arith.constant 14 : index
    %c0_19 = arith.constant 0 : index
    %53 = vector.load %arg1[%c14, %c0_19] : memref<48x128xf32, #tpu.memory_space<vmem>>, vector<4x128xf32>
    %54 = vector.broadcast %52 : f32 to vector<4x128xf32>
    %55 = arith.mulf %54, %53 : vector<4x128xf32>
    %56 = arith.addf %51, %55 : vector<4x128xf32>
    %c5 = arith.constant 5 : index
    %57 = memref.load %arg2[%c5] : memref<17xf32, #tpu.memory_space<smem>>
    %58 = vector.broadcast %0 : f32 to vector<4x128xf32>
    %59 = arith.addf %56, %58 : vector<4x128xf32>
    %60 = math.tanh %59 : vector<4x128xf32>
    %61 = vector.broadcast %57 : f32 to vector<4x128xf32>
    %62 = arith.mulf %61, %60 : vector<4x128xf32>
    %63 = arith.addf %42, %62 : vector<4x128xf32>
    %c0_20 = arith.constant 0 : index
    %64 = memref.load %arg2[%c0_20] : memref<17xf32, #tpu.memory_space<smem>>
    %c18 = arith.constant 18 : index
    %c0_21 = arith.constant 0 : index
    %65 = vector.load %arg1[%c18, %c0_21] : memref<48x128xf32, #tpu.memory_space<vmem>>, vector<4x128xf32>
    %66 = vector.broadcast %64 : f32 to vector<4x128xf32>
    %67 = arith.mulf %66, %65 : vector<4x128xf32>
    %c1_22 = arith.constant 1 : index
    %68 = memref.load %arg2[%c1_22] : memref<17xf32, #tpu.memory_space<smem>>
    %c19 = arith.constant 19 : index
    %c0_23 = arith.constant 0 : index
    %69 = vector.load %arg1[%c19, %c0_23] : memref<48x128xf32, #tpu.memory_space<vmem>>, vector<4x128xf32>
    %70 = vector.broadcast %68 : f32 to vector<4x128xf32>
    %71 = arith.mulf %70, %69 : vector<4x128xf32>
    %72 = arith.addf %67, %71 : vector<4x128xf32>
    %c2_24 = arith.constant 2 : index
    %73 = memref.load %arg2[%c2_24] : memref<17xf32, #tpu.memory_space<smem>>
    %c20 = arith.constant 20 : index
    %c0_25 = arith.constant 0 : index
    %74 = vector.load %arg1[%c20, %c0_25] : memref<48x128xf32, #tpu.memory_space<vmem>>, vector<4x128xf32>
    %75 = vector.broadcast %73 : f32 to vector<4x128xf32>
    %76 = arith.mulf %75, %74 : vector<4x128xf32>
    %77 = arith.addf %72, %76 : vector<4x128xf32>
    %c6_26 = arith.constant 6 : index
    %78 = memref.load %arg2[%c6_26] : memref<17xf32, #tpu.memory_space<smem>>
    %79 = vector.broadcast %0 : f32 to vector<4x128xf32>
    %80 = arith.addf %77, %79 : vector<4x128xf32>
    %81 = math.tanh %80 : vector<4x128xf32>
    %82 = vector.broadcast %78 : f32 to vector<4x128xf32>
    %83 = arith.mulf %82, %81 : vector<4x128xf32>
    %84 = arith.addf %63, %83 : vector<4x128xf32>
    %85 = vector.broadcast %1 : f32 to vector<4x128xf32>
    %86 = arith.addf %84, %85 : vector<4x128xf32>
    %87 = math.tanh %86 : vector<4x128xf32>
    %cst = arith.constant 0.000000e+00 : f32
    %88 = vector.broadcast %cst : f32 to vector<4x128xf32>
    %89 = tpu.concatenate %87, %88 in 0 : vector<4x128xf32>, vector<4x128xf32> -> vector<8x128xf32>
    %c15 = arith.constant 15 : index
    %90 = memref.load %arg2[%c15] : memref<17xf32, #tpu.memory_space<smem>>
    %c16 = arith.constant 16 : index
    %91 = memref.load %arg2[%c16] : memref<17xf32, #tpu.memory_space<smem>>
    %c9 = arith.constant 9 : index
    %92 = memref.load %arg2[%c9] : memref<17xf32, #tpu.memory_space<smem>>
    %c24 = arith.constant 24 : index
    %c0_27 = arith.constant 0 : index
    %93 = vector.load %arg1[%c24, %c0_27] : memref<48x128xf32, #tpu.memory_space<vmem>>, vector<6x128xf32>
    %94 = vector.broadcast %92 : f32 to vector<6x128xf32>
    %95 = arith.mulf %94, %93 : vector<6x128xf32>
    %c10 = arith.constant 10 : index
    %96 = memref.load %arg2[%c10] : memref<17xf32, #tpu.memory_space<smem>>
    %c25 = arith.constant 25 : index
    %c0_28 = arith.constant 0 : index
    %97 = vector.load %arg1[%c25, %c0_28] : memref<48x128xf32, #tpu.memory_space<vmem>>, vector<6x128xf32>
    %98 = vector.broadcast %96 : f32 to vector<6x128xf32>
    %99 = arith.mulf %98, %97 : vector<6x128xf32>
    %100 = arith.addf %95, %99 : vector<6x128xf32>
    %c11 = arith.constant 11 : index
    %101 = memref.load %arg2[%c11] : memref<17xf32, #tpu.memory_space<smem>>
    %c26 = arith.constant 26 : index
    %c0_29 = arith.constant 0 : index
    %102 = vector.load %arg1[%c26, %c0_29] : memref<48x128xf32, #tpu.memory_space<vmem>>, vector<6x128xf32>
    %103 = vector.broadcast %101 : f32 to vector<6x128xf32>
    %104 = arith.mulf %103, %102 : vector<6x128xf32>
    %105 = arith.addf %100, %104 : vector<6x128xf32>
    %c12_30 = arith.constant 12 : index
    %106 = memref.load %arg2[%c12_30] : memref<17xf32, #tpu.memory_space<smem>>
    %107 = vector.broadcast %90 : f32 to vector<6x128xf32>
    %108 = arith.addf %105, %107 : vector<6x128xf32>
    %109 = math.tanh %108 : vector<6x128xf32>
    %110 = vector.broadcast %106 : f32 to vector<6x128xf32>
    %111 = arith.mulf %110, %109 : vector<6x128xf32>
    %c9_31 = arith.constant 9 : index
    %112 = memref.load %arg2[%c9_31] : memref<17xf32, #tpu.memory_space<smem>>
    %c32 = arith.constant 32 : index
    %c0_32 = arith.constant 0 : index
    %113 = vector.load %arg1[%c32, %c0_32] : memref<48x128xf32, #tpu.memory_space<vmem>>, vector<6x128xf32>
    %114 = vector.broadcast %112 : f32 to vector<6x128xf32>
    %115 = arith.mulf %114, %113 : vector<6x128xf32>
    %c10_33 = arith.constant 10 : index
    %116 = memref.load %arg2[%c10_33] : memref<17xf32, #tpu.memory_space<smem>>
    %c33 = arith.constant 33 : index
    %c0_34 = arith.constant 0 : index
    %117 = vector.load %arg1[%c33, %c0_34] : memref<48x128xf32, #tpu.memory_space<vmem>>, vector<6x128xf32>
    %118 = vector.broadcast %116 : f32 to vector<6x128xf32>
    %119 = arith.mulf %118, %117 : vector<6x128xf32>
    %120 = arith.addf %115, %119 : vector<6x128xf32>
    %c11_35 = arith.constant 11 : index
    %121 = memref.load %arg2[%c11_35] : memref<17xf32, #tpu.memory_space<smem>>
    %c34 = arith.constant 34 : index
    %c0_36 = arith.constant 0 : index
    %122 = vector.load %arg1[%c34, %c0_36] : memref<48x128xf32, #tpu.memory_space<vmem>>, vector<6x128xf32>
    %123 = vector.broadcast %121 : f32 to vector<6x128xf32>
    %124 = arith.mulf %123, %122 : vector<6x128xf32>
    %125 = arith.addf %120, %124 : vector<6x128xf32>
    %c13_37 = arith.constant 13 : index
    %126 = memref.load %arg2[%c13_37] : memref<17xf32, #tpu.memory_space<smem>>
    %127 = vector.broadcast %90 : f32 to vector<6x128xf32>
    %128 = arith.addf %125, %127 : vector<6x128xf32>
    %129 = math.tanh %128 : vector<6x128xf32>
    %130 = vector.broadcast %126 : f32 to vector<6x128xf32>
    %131 = arith.mulf %130, %129 : vector<6x128xf32>
    %132 = arith.addf %111, %131 : vector<6x128xf32>
    %c9_38 = arith.constant 9 : index
    %133 = memref.load %arg2[%c9_38] : memref<17xf32, #tpu.memory_space<smem>>
    %c40 = arith.constant 40 : index
    %c0_39 = arith.constant 0 : index
    %134 = vector.load %arg1[%c40, %c0_39] : memref<48x128xf32, #tpu.memory_space<vmem>>, vector<6x128xf32>
    %135 = vector.broadcast %133 : f32 to vector<6x128xf32>
    %136 = arith.mulf %135, %134 : vector<6x128xf32>
    %c10_40 = arith.constant 10 : index
    %137 = memref.load %arg2[%c10_40] : memref<17xf32, #tpu.memory_space<smem>>
    %c41 = arith.constant 41 : index
    %c0_41 = arith.constant 0 : index
    %138 = vector.load %arg1[%c41, %c0_41] : memref<48x128xf32, #tpu.memory_space<vmem>>, vector<6x128xf32>
    %139 = vector.broadcast %137 : f32 to vector<6x128xf32>
    %140 = arith.mulf %139, %138 : vector<6x128xf32>
    %141 = arith.addf %136, %140 : vector<6x128xf32>
    %c11_42 = arith.constant 11 : index
    %142 = memref.load %arg2[%c11_42] : memref<17xf32, #tpu.memory_space<smem>>
    %c42 = arith.constant 42 : index
    %c0_43 = arith.constant 0 : index
    %143 = vector.load %arg1[%c42, %c0_43] : memref<48x128xf32, #tpu.memory_space<vmem>>, vector<6x128xf32>
    %144 = vector.broadcast %142 : f32 to vector<6x128xf32>
    %145 = arith.mulf %144, %143 : vector<6x128xf32>
    %146 = arith.addf %141, %145 : vector<6x128xf32>
    %c14_44 = arith.constant 14 : index
    %147 = memref.load %arg2[%c14_44] : memref<17xf32, #tpu.memory_space<smem>>
    %148 = vector.broadcast %90 : f32 to vector<6x128xf32>
    %149 = arith.addf %146, %148 : vector<6x128xf32>
    %150 = math.tanh %149 : vector<6x128xf32>
    %151 = vector.broadcast %147 : f32 to vector<6x128xf32>
    %152 = arith.mulf %151, %150 : vector<6x128xf32>
    %153 = arith.addf %132, %152 : vector<6x128xf32>
    %154 = vector.broadcast %91 : f32 to vector<6x128xf32>
    %155 = arith.addf %153, %154 : vector<6x128xf32>
    %156 = math.tanh %155 : vector<6x128xf32>
    %cst_45 = arith.constant 0.000000e+00 : f32
    %157 = vector.broadcast %cst_45 : f32 to vector<2x128xf32>
    %158 = tpu.concatenate %156, %157 in 0 : vector<6x128xf32>, vector<2x128xf32> -> vector<8x128xf32>
    %159 = tpu.concatenate %89, %158 in 0 : vector<8x128xf32>, vector<8x128xf32> -> vector<16x128xf32>
    %c0_46 = arith.constant 0 : index
    %c0_47 = arith.constant 0 : index
    %160 = vector.load %arg5[%c0_46, %c0_47] : memref<256x8xf32, #tpu.memory_space<vmem>>, vector<128x1xf32>
    %c0_48 = arith.constant 0 : index
    %c1_49 = arith.constant 1 : index
    %161 = vector.load %arg5[%c0_48, %c1_49] : memref<256x8xf32, #tpu.memory_space<vmem>>, vector<256x1xf32>
    %c0_50 = arith.constant 0 : index
    %c2_51 = arith.constant 2 : index
    %162 = vector.load %arg5[%c0_50, %c2_51] : memref<256x8xf32, #tpu.memory_space<vmem>>, vector<128x1xf32>
    %c0_52 = arith.constant 0 : index
    %c3_53 = arith.constant 3 : index
    %163 = vector.load %arg5[%c0_52, %c3_53] : memref<256x8xf32, #tpu.memory_space<vmem>>, vector<128x1xf32>
    %c0_54 = arith.constant 0 : index
    %c0_55 = arith.constant 0 : index
    %164 = vector.load %arg3[%c0_54, %c0_55] : memref<128x16xbf16, #tpu.memory_space<vmem>>, vector<128x16xbf16>
    %165 = arith.truncf %159 : vector<16x128xf32> to vector<16x128xbf16>
    %cst_56 = arith.constant dense<0.000000e+00> : vector<128x128xf32>
    %166 = tpu.matmul %164, %165, %cst_56 {dimension_numbers = #tpu.dot_dimension_numbers<[1], [0], [0], [1], [0, 0, 1, 1], [], []>} : vector<128x16xbf16>, vector<16x128xbf16>, vector<128x128xf32> -> vector<128x128xf32>
    %167 = vector.broadcast %160 : vector<128x1xf32> to vector<128x128xf32>
    %168 = arith.addf %166, %167 : vector<128x128xf32>
    %cst_57 = arith.constant 0.00999999977 : f32
    %169 = vector.broadcast %cst_57 : f32 to vector<128x128xf32>
    %170 = arith.mulf %169, %168 : vector<128x128xf32>
    %171 = arith.maximumf %168, %170 : vector<128x128xf32>
    %c0_58 = arith.constant 0 : index
    %c0_59 = arith.constant 0 : index
    %172 = vector.load %arg4[%c0_58, %c0_59] : memref<256x128xbf16, #tpu.memory_space<vmem>>, vector<256x128xbf16>
    %173 = arith.truncf %171 : vector<128x128xf32> to vector<128x128xbf16>
    %cst_60 = arith.constant dense<0.000000e+00> : vector<256x128xf32>
    %174 = tpu.matmul %172, %173, %cst_60 {dimension_numbers = #tpu.dot_dimension_numbers<[1], [0], [0], [1], [0, 0, 1, 1], [], []>} : vector<256x128xbf16>, vector<128x128xbf16>, vector<256x128xf32> -> vector<256x128xf32>
    %175 = vector.broadcast %161 : vector<256x1xf32> to vector<256x128xf32>
    %176 = arith.addf %174, %175 : vector<256x128xf32>
    %177 = tpu.iota {dimensions = array<i32: 0>} : vector<128x1xi32>
    %c16_i32 = arith.constant 16 : i32
    %178 = vector.broadcast %c16_i32 : i32 to vector<128x1xi32>
    %179 = arith.cmpi slt, %177, %178 : vector<128x1xi32>
    %180 = vector.extract_strided_slice %176 {offsets = [0, 0], sizes = [128, 128], strides = [1, 1]} : vector<256x128xf32> to vector<128x128xf32>
    %cst_61 = arith.constant dense<0.000000e+00> : vector<128xf32>
    %181 = vector.multi_reduction <add>, %180, %cst_61 [0] : vector<128x128xf32> to vector<128xf32>
    %182 = vector.shape_cast %181 : vector<128xf32> to vector<1x128xf32>
    %cst_62 = arith.constant 6.250000e-02 : f32
    %183 = vector.broadcast %cst_62 : f32 to vector<1x128xf32>
    %184 = arith.mulf %182, %183 : vector<1x128xf32>
    %185 = vector.broadcast %184 : vector<1x128xf32> to vector<128x128xf32>
    %186 = arith.subf %180, %185 : vector<128x128xf32>
    %cst_63 = arith.constant 0.000000e+00 : f32
    %187 = vector.shape_cast %179 : vector<128x1xi1> to vector<128x1xi1>
    %188 = vector.broadcast %187 : vector<128x1xi1> to vector<128x128xi1>
    %189 = vector.broadcast %cst_63 : f32 to vector<128x128xf32>
    %190 = arith.select %188, %186, %189 : vector<128x128xi1>, vector<128x128xf32>
    %191 = arith.mulf %190, %190 : vector<128x128xf32>
    %cst_64 = arith.constant dense<0.000000e+00> : vector<128xf32>
    %192 = vector.multi_reduction <add>, %191, %cst_64 [0] : vector<128x128xf32> to vector<128xf32>
    %193 = vector.shape_cast %192 : vector<128xf32> to vector<1x128xf32>
    %cst_65 = arith.constant 6.250000e-02 : f32
    %194 = vector.broadcast %cst_65 : f32 to vector<1x128xf32>
    %195 = arith.mulf %193, %194 : vector<1x128xf32>
    %cst_66 = arith.constant 9.99999974E-6 : f32
    %196 = vector.broadcast %cst_66 : f32 to vector<1x128xf32>
    %197 = arith.addf %195, %196 : vector<1x128xf32>
    %198 = math.rsqrt %197 : vector<1x128xf32>
    %199 = vector.broadcast %198 : vector<1x128xf32> to vector<128x128xf32>
    %200 = arith.mulf %190, %199 : vector<128x128xf32>
    %201 = vector.broadcast %162 : vector<128x1xf32> to vector<128x128xf32>
    %202 = arith.mulf %200, %201 : vector<128x128xf32>
    %203 = vector.broadcast %163 : vector<128x1xf32> to vector<128x128xf32>
    %204 = arith.addf %202, %203 : vector<128x128xf32>
    %c0_67 = arith.constant 0 : index
    %c0_68 = arith.constant 0 : index
    %205 = vector.load %arg6[%c0_67, %c0_68] : memref<256x128xf32, #tpu.memory_space<vmem>>, vector<128x128xf32>
    tpu.vector_store %arg6[%c0_67, %c0_68], %204 {strides = array<i32>} : memref<256x128xf32, #tpu.memory_space<vmem>>, vector<128x128xf32>,
    %206 = vector.extract_strided_slice %176 {offsets = [128, 0], sizes = [128, 128], strides = [1, 1]} : vector<256x128xf32> to vector<128x128xf32>
    %cst_69 = arith.constant dense<0.000000e+00> : vector<128xf32>
    %207 = vector.multi_reduction <add>, %206, %cst_69 [0] : vector<128x128xf32> to vector<128xf32>
    %208 = vector.shape_cast %207 : vector<128xf32> to vector<1x128xf32>
    %cst_70 = arith.constant 6.250000e-02 : f32
    %209 = vector.broadcast %cst_70 : f32 to vector<1x128xf32>
    %210 = arith.mulf %208, %209 : vector<1x128xf32>
    %211 = vector.broadcast %210 : vector<1x128xf32> to vector<128x128xf32>
    %212 = arith.subf %206, %211 : vector<128x128xf32>
    %cst_71 = arith.constant 0.000000e+00 : f32
    %213 = vector.shape_cast %179 : vector<128x1xi1> to vector<128x1xi1>
    %214 = vector.broadcast %213 : vector<128x1xi1> to vector<128x128xi1>
    %215 = vector.broadcast %cst_71 : f32 to vector<128x128xf32>
    %216 = arith.select %214, %212, %215 : vector<128x128xi1>, vector<128x128xf32>
    %217 = arith.mulf %216, %216 : vector<128x128xf32>
    %cst_72 = arith.constant dense<0.000000e+00> : vector<128xf32>
    %218 = vector.multi_reduction <add>, %217, %cst_72 [0] : vector<128x128xf32> to vector<128xf32>
    %219 = vector.shape_cast %218 : vector<128xf32> to vector<1x128xf32>
    %cst_73 = arith.constant 6.250000e-02 : f32
    %220 = vector.broadcast %cst_73 : f32 to vector<1x128xf32>
    %221 = arith.mulf %219, %220 : vector<1x128xf32>
    %cst_74 = arith.constant 9.99999974E-6 : f32
    %222 = vector.broadcast %cst_74 : f32 to vector<1x128xf32>
    %223 = arith.addf %221, %222 : vector<1x128xf32>
    %224 = math.rsqrt %223 : vector<1x128xf32>
    %225 = vector.broadcast %224 : vector<1x128xf32> to vector<128x128xf32>
    %226 = arith.mulf %216, %225 : vector<128x128xf32>
    %227 = vector.broadcast %162 : vector<128x1xf32> to vector<128x128xf32>
    %228 = arith.mulf %226, %227 : vector<128x128xf32>
    %229 = vector.broadcast %163 : vector<128x1xf32> to vector<128x128xf32>
    %230 = arith.addf %228, %229 : vector<128x128xf32>
    %c128 = arith.constant 128 : index
    %c0_75 = arith.constant 0 : index
    %231 = vector.load %arg6[%c128, %c0_75] : memref<256x128xf32, #tpu.memory_space<vmem>>, vector<128x128xf32>
    tpu.vector_store %arg6[%c128, %c0_75], %230 {strides = array<i32>} : memref<256x128xf32, #tpu.memory_space<vmem>>, vector<128x128xf32>,
    return
  }
  func.func @transform_0(%arg0: i32) -> (i32, i32) {
    %c0_i32 = arith.constant 0 : i32
    %c0_i32_0 = arith.constant 0 : i32
    return %c0_i32, %arg0 : i32, i32
  }
  func.func @transform_1(%arg0: i32) -> i32 {
    %c0_i32 = arith.constant 0 : i32
    %c0_i32_0 = arith.constant 0 : i32
    return %c0_i32 : i32
  }
  func.func @transform_2(%arg0: i32) -> (i32, i32) {
    %c0_i32 = arith.constant 0 : i32
    %c0_i32_0 = arith.constant 0 : i32
    %c0_i32_1 = arith.constant 0 : i32
    return %c0_i32, %c0_i32_0 : i32, i32
  }
  func.func @transform_3(%arg0: i32) -> (i32, i32) {
    %c0_i32 = arith.constant 0 : i32
    %c0_i32_0 = arith.constant 0 : i32
    %c0_i32_1 = arith.constant 0 : i32
    return %c0_i32, %c0_i32_0 : i32, i32
  }
  func.func @transform_4(%arg0: i32) -> (i32, i32) {
    %c0_i32 = arith.constant 0 : i32
    %c0_i32_0 = arith.constant 0 : i32
    %c0_i32_1 = arith.constant 0 : i32
    return %c0_i32, %c0_i32_0 : i32, i32
  }
  func.func @transform_5(%arg0: i32) -> (i32, i32) {
    %c0_i32 = arith.constant 0 : i32
    %c0_i32_0 = arith.constant 0 : i32
    return %c0_i32, %arg0 : i32, i32
  }
}

</mosaic_0001>

<bundles_post_ra>
// kernel: _lambda_.1
= control target key start
LH: loop header
LB: loop body
LE: loop exit
PB: predicated region body
PF: predicated region fallthrough
CT: control target
= control target key end

     0   :  { %10 = vsyncpa [#allocation3], 0  ;;  %s2407_s0 = inlined_call_operand.vmem [shape: f32[48,128], index: 0, kind: input, shape index: {}]   ;;  %s2408_s1 = inlined_call_operand.vmem [shape: f32[17], index: 1, kind: input, shape index: {}]   ;;  %s2409_s2 = inlined_call_operand.vmem [shape: bf16[128,16], index: 2, kind: input, shape index: {}]   ;;  %s2410_s3 = inlined_call_operand.vmem [shape: bf16[256,128], index: 3, kind: input, shape index: {}]   ;;  %s2411_s4 = inlined_call_operand.vmem [shape: f32[256,8], index: 4, kind: input, shape index: {}]   ;;  %s2412_s5 = inlined_call_operand.vmem [shape: f32[256,128], index: 5, kind: output, shape index: {}]  }
   0x1   :  { %s19_s20 = sshll.u32 %s2408_s1, 4  ;;  %s20_s20 = int_to_ptr.vmem [resolvable:$true] %s19_s20 }
   0x2   :  { %s1661_s21 = scalar_lea.vmem %s20_s20, 16  ;;  %p1666_p1 = scmp.lt.s32.totalorder %s20_s20, %s20_s20 }
   0x3   :  { %p1662_p0 = scmp.ne.s32.totalorder %s20_s20, %s1661_s21  ;;  %p1667_p2 = scmp.lt.s32.totalorder %s1661_s21, %s1661_s21 }
   0x5   :  { %p1668_p3 = por %p1667_p2, %p1666_p1 }
   0x7   :  { %p1669_p4 = pnand %p1668_p3, %p1662_p0 }
   0x9   :  { %1672 = shalt.err (!%p1669_p4)
}
   0xa   :  { %s1675_s22 = smov [#allocation2]  }
   0xb   :  { %22 = dma.vmem_to_smem %s20_s20, 16, %s1675_s22, [#allocation3]  }
   0xc   :  { %1673 = dma.done.wait [#allocation3], 16  }
   0xd   :  { %1674 = vsyncadd [#allocation3], 4294967280 }
   0xe   :  { %32 = sfence }
   0xf   :  { %s36_s23 = sld [smem:[#allocation2]]  ;;  %s1438_s24 = sld [smem:[#allocation2 + $0x1]]  ;;  %v37_v0 = vld [vmem:[%s2407_s0] sm:$0xf]  ;;  %v56_v3 = vld [vmem:[%s2407_s0 + $0x6] sm:$0xf] }
  0x10   :  { %s1439_s25 = sld [smem:[#allocation2 + $0x2]]  ;;  %s1436_s26 = sld [smem:[#allocation2 + $0x7]]  ;;  %v41_v1 = vld [vmem:[%s2407_s0 + $0x1] sm:$0xf]  ;;  %v58_v4 = vld [vmem:[%s2407_s0 + $0x7] sm:$0xf] }
  0x11   :  { %v46_v2 = vld [vmem:[%s2407_s0 + $0x2] sm:$0xf]  ;;  %v61_v5 = vld [vmem:[%s2407_s0 + $0x8] sm:$0xf]  ;;  %v70_v6 = vld [vmem:[%s2407_s0 + $0xc] sm:$0xf] }
  0x12   :  { %v72_v9 = vld [vmem:[%s2407_s0 + $0xd] sm:$0xf]  ;;  %v84_v14 = vld [vmem:[%s2407_s0 + $0x12] sm:$0xf]  ;;  %s1743_s21 = sld [smem:[#allocation2 + $0x9]]  ;;  %s1745_s22 = sld [smem:[#allocation2 + $0xa]] }
  0x13   :  { %v75_v10 = vld [vmem:[%s2407_s0 + $0xe] sm:$0xf]  ;;  %v86_v19 = vld [vmem:[%s2407_s0 + $0x13] sm:$0xf]  ;;  %s1755_s1 = sld [smem:[#allocation2 + $0x3]]  ;;  %s1757_s29 = sld [smem:[#allocation2 + $0x4]] }
  0x14   :  { %v89_v20 = vld [vmem:[%s2407_s0 + $0x14] sm:$0xf]  ;;  %s1759_s30 = sld [smem:[#allocation2 + $0xf]]  ;;  %v106_v32 = vld [vmem:[%s2407_s0 + $0x18] sm:$0x3f]  ;;  %s1780_s17 = sld [smem:[#allocation2 + $0x5]] }
  0x15   :  { %v38_v7 = vstv %s36_s23  ;;  %v42_v8 = vstv %s1438_s24  ;;  %v110_v33 = vld [vmem:[%s2407_s0 + $0x19] sm:$0x3f]  ;;  %v125_v36 = vld [vmem:[%s2407_s0 + $0x20] sm:$0x3f]  ;;  %s1797_s28 = sld [smem:[#allocation2 + $0x6]]  ;;  %vm327_vm0 = vcmask 130048  }
  0x16   :  { %v39_v11 = vmul.f32 %v38_v7, %v37_v0  ;;  %v43_v12 = vmul.f32 %v42_v8, %v41_v1  ;;  %v47_v13 = vstv %s1439_s25  ;;  %v57_v16 = vmul.f32 %v56_v3, %v38_v7  ;;  %s1753_s25 = sld [smem:[#allocation2 + $0xb]]  ;;  %v115_v34 = vld [vmem:[%s2407_s0 + $0x1a] sm:$0x3f]  ;;  %v127_v37 = vld [vmem:[%s2407_s0 + $0x21] sm:$0x3f]  ;;  %s1811_s7 = sld [smem:[#allocation2 + $0xc]] }
  0x17   :  { %v48_v15 = vmul.f32 %v47_v13, %v46_v2  ;;  %v59_v17 = vmul.f32 %v58_v4, %v42_v8  ;;  %v62_v18 = vmul.f32 %v61_v5, %v47_v13  ;;  %v71_v22 = vmul.f32 %v70_v6, %v38_v7  ;;  %v130_v42 = vld [vmem:[%s2407_s0 + $0x22] sm:$0x3f]  ;;  %v139_v47 = vld [vmem:[%s2407_s0 + $0x28] sm:$0x3f]  ;;  %v1808_v6 = vld [vmem:[%s2411_s4 + $0x10] sm:$0xff]  ;;  %s1815_s8 = sld [smem:[#allocation2 + $0x8]] }
  0x18   :  { %v44_v21 = vadd.f32 %v43_v12, %v39_v11  ;;  %v73_v23 = vmul.f32 %v72_v9, %v42_v8  ;;  %v51_v24 = vstv %s1436_s26  ;;  %v76_v26 = vmul.f32 %v75_v10, %v47_v13  ;;  %v141_v51 = vld [vmem:[%s2407_s0 + $0x29] sm:$0x3f]  ;;  %v1615_v58 = vld [vmem:[%s2409_s2] sm:$0xff]   ;;  %s1818_s26 = sld [smem:[#allocation2 + $0x10]]  ;;  %s1831_s12 = sld [smem:[#allocation2 + $0xd]] }
  0x19   :  { %v60_v25 = vadd.f32 %v59_v17, %v57_v16  ;;  %v85_v27 = vmul.f32 %v84_v14, %v38_v7  ;;  %v87_v30 = vmul.f32 %v86_v19, %v42_v8  ;;  %v90_v31 = vmul.f32 %v89_v20, %v47_v13  ;;  %v144_v54 = vld [vmem:[%s2407_s0 + $0x2a] sm:$0x3f]  ;;  %1522 = vmatprep.mubr.msk.bf16.mxu0 %vm327_vm0, %v1615_v58  ;;  %v1803_v5 = vld [vmem:[%s2411_s4] sm:$0xff]  ;;  %v1828_v14 = vld [vmem:[%s2411_s4 + $0x18] sm:$0xff] }
  0x1a   :  { %v49_v28 = vadd.f32 %v48_v15, %v44_v21  ;;  %v74_v29 = vadd.f32 %v73_v23, %v71_v22  ;;  %v107_v41 = vstv %s1743_s21  ;;  %v111_v45 = vstv %s1745_s22  ;;  %v1823_v13 = vld [vmem:[%s2411_s4 + $0x8] sm:$0xff]  ;;  %v1838_v19 = vld [vmem:[%s2411_s4 + $0x20] sm:$0xff] }
  0x1b   :  { %v63_v35 = vadd.f32 %v62_v18, %v60_v25  ;;  %v88_v40 = vadd.f32 %v87_v30, %v85_v27  ;;  %v108_v44 = vmul.f32 %v107_v41, %v106_v32  ;;  %v112_v50 = vmul.f32 %v111_v45, %v110_v33  ;;  %v1843_v20 = vld [vmem:[%s2411_s4 + $0x28] sm:$0xff] }
  0x1c   :  { %v52_v38 = vadd.f32 %v51_v24, %v49_v28  ;;  %v77_v39 = vadd.f32 %v76_v26, %v74_v29  ;;  %v116_v46 = vstv %s1753_s25  ;;  %v126_v53 = vmul.f32 %v125_v36, %v107_v41  ;;  %v1851_v28 = vld [vmem:[%s2411_s4 + $0x30] sm:$0xff]  ;;  %v1856_v29 = vld [vmem:[%s2411_s4 + $0x38] sm:$0xff]  ;;  %v1616_v58 = vld [vmem:[%s2409_s2 + $0x8] sm:$0xff]  }
  0x1d   :  { %v65_v43 = vadd.f32 %v63_v35, %v51_v24  ;;  %v91_v49 = vadd.f32 %v90_v31, %v88_v40  ;;  %v117_v52 = vmul.f32 %v116_v46, %v115_v34  ;;  %v113_v56 = vadd.f32 %v112_v50, %v108_v44 }
  0x1e   :  { %1639 = vtanh.f32 %v52_v38  ;;  %v79_v48 = vadd.f32 %v77_v39, %v51_v24  ;;  %v128_v57 = vmul.f32 %v127_v37, %v111_v45  ;;  %v120_v59 = vstv %s1759_s30  ;;  %v1866_v37 = vld [vmem:[%s2411_s4 + $0x40] sm:$0xff]  ;;  %v1871_v38 = vld [vmem:[%s2411_s4 + $0x48] sm:$0xff] }
  0x1f   :  { %1641 = vtanh.f32 %v65_v43  ;;  %v93_v55 = vadd.f32 %v91_v49, %v51_v24  ;;  %v131_v60 = vmul.f32 %v130_v42, %v116_v46  ;;  %v140_v61 = vmul.f32 %v139_v47, %v107_v41  ;;  %v1887_v49 = vld [vmem:[%s2411_s4 + $0x58] sm:$0xff] }
  0x20   :  { %1643 = vtanh.f32 %v79_v48  ;;  %v142_v62 = vmul.f32 %v141_v51, %v111_v45  ;;  %v118_v63 = vadd.f32 %v117_v52, %v113_v56  ;;  %v129_v0 = vadd.f32 %v128_v57, %v126_v53  ;;  %v1882_v48 = vld [vmem:[%s2411_s4 + $0x50] sm:$0xff]  ;;  %v1894_v51 = vld [vmem:[%s2411_s4 + $0x60] sm:$0xff]  ;;  %v1899_v52 = vld [vmem:[%s2411_s4 + $0x68] sm:$0xff] }
  0x21   :  { %1645 = vtanh.f32 %v93_v55  ;;  %v145_v1 = vmul.f32 %v144_v54, %v116_v46  ;;  %v1676_v8 = vmov 0   ;;  %v54_v9 = vstv %s1755_s1  ;;  %v1906_v53 = vld [vmem:[%s2411_s4 + $0x70] sm:$0xff]  ;;  %v1911_v54 = vld [vmem:[%s2411_s4 + $0x78] sm:$0xff] }
  0x22   :  { %v143_v2 = vadd.f32 %v142_v62, %v140_v61  ;;  %v121_v3 = vadd.f32 %v120_v59, %v118_v63  ;;  %v132_v4 = vadd.f32 %v131_v60, %v129_v0  ;;  %1607 = vset.pattern.permute.xlu0 %v1676_v8  ;;  %1608 = vset.pattern.permute.xlu1 %v1676_v8  ;;  %v67_v11 = vstv %s1757_s29  ;;  %s1833_s29 = sld [smem:[#allocation2 + $0xe]]  ;;  %v1618_v60 = vld [vmem:[%s2409_s2 + $0x18] sm:$0xff]   ;;  %v1619_v61 = vld [vmem:[%s2409_s2 + $0x20] sm:$0xff]   ;;  %v1620_v62 = vld [vmem:[%s2409_s2 + $0x28] sm:$0xff]  }
  0x23   :  { %209 = vperm.xlu0 %1607, %v1803_v5   ;;  %219 = vperm.xlu1 %1608, %v1808_v6   ;;  %v81_v16 = vstv %s1780_s17  ;;  %v95_v23 = vstv %s1797_s28  ;;  %v123_v31 = vstv %s1811_s7  ;;  %v136_v33 = vstv %s1831_s12 }
  0x24   :  { %v146_v7 = vadd.f32 %v145_v1, %v143_v2  ;;  %1647 = vtanh.f32 %v121_v3  ;;  %v134_v10 = vadd.f32 %v132_v4, %v120_v59  ;;  %v98_v40 = vstv %s1815_s8  ;;  %v1621_v63 = vld [vmem:[%s2409_s2 + $0x30] sm:$0xff]   ;;  %v1622_v0 = vld [vmem:[%s2409_s2 + $0x38] sm:$0xff]   ;;  %v1623_v2 = vld [vmem:[%s2410_s3] sm:$0xff]  }
  0x25   :  { %v153_v46 = vstv %s1818_s26  ;;  %vm101_vm1 = vcmask 1043456   ;;  %vm156_vm2 = vcmask 1045504   ;;  %v1677_v1 = vmov 1   ;;  %v1624_v3 = vld [vmem:[%s2410_s3 + $0x30] sm:$0xff]   ;;  %v174_v4 = vld [vmem:[%s2411_s4 + $0x80] sm:$0xff]  ;;  %v175_v8 = vld [vmem:[%s2411_s4 + $0x88] sm:$0xff] }
  0x26   :  { %v148_v12 = vadd.f32 %v146_v7, %v120_v59  ;;  %1649 = vtanh.f32 %v134_v10  ;;  %vm1460_vm3 = vmpackc.low %vm156_vm2, %vm101_vm1  ;;  %v1617_v59 = vld [vmem:[%s2409_s2 + $0x10] sm:$0xff]   ;;  %1566 = vmatprep.mubr.bf16.mxu1 %v1624_v3  ;;  %v177_v10 = vld [vmem:[%s2411_s4 + $0x98] sm:$0xff] }
  0x27   :  { %214 = vperm.xlu0 %1607, %v1823_v13   ;;  %224 = vperm.xlu1 %1608, %v1828_v14   ;;  %v176_v7 = vld [vmem:[%s2411_s4 + $0x90] sm:$0xff] }
  0x28   :  { %v1640_v15 = vpop.eup %1639  ;;  %1651 = vtanh.f32 %v148_v12  ;;  %v150_v36 = vstv %s1833_s29  ;;  %v179_v12 = vld [vmem:[%s2411_s4 + $0xa8] sm:$0xff] }
  0x29   :  { %v1642_v17 = vpop.eup %1641  ;;  %v55_v18 = vmul.f32 %v1640_v15, %v54_v9  ;;  %v178_v9 = vld [vmem:[%s2411_s4 + $0xa0] sm:$0xff] }
  0x2a   :  { %v1644_v21 = vpop.eup %1643  ;;  %v68_v22 = vmul.f32 %v1642_v17, %v67_v11  ;;  %v180_v11 = vld [vmem:[%s2411_s4 + $0xb0] sm:$0xff]  ;;  %v182_v15 = vld [vmem:[%s2411_s4 + $0xc0] sm:$0xff] }
  0x2b   :  { %v82_v24 = vmul.f32 %v1644_v21, %v81_v16  ;;  %v1646_v25 = vpop.eup %1645  ;;  %229 = vperm.xlu0 %1607, %v1838_v19   ;;  %234 = vperm.xlu1 %1608, %v1843_v20   ;;  %v181_v16 = vld [vmem:[%s2411_s4 + $0xb8] sm:$0xff]  ;;  %v184_v17 = vld [vmem:[%s2411_s4 + $0xd0] sm:$0xff]  ;;  %v186_v21 = vld [vmem:[%s2411_s4 + $0xe0] sm:$0xff] }
  0x2c   :  { %v69_v26 = vadd.f32 %v68_v22, %v55_v18  ;;  %v96_v27 = vmul.f32 %v1646_v25, %v95_v23  ;;  %v183_v18 = vld [vmem:[%s2411_s4 + $0xc8] sm:$0xff]  ;;  %v185_v22 = vld [vmem:[%s2411_s4 + $0xd8] sm:$0xff]  ;;  %v188_v23 = vld [vmem:[%s2411_s4 + $0xf0] sm:$0xff] }
  0x2d   :  { %v189_v25 = vld [vmem:[%s2411_s4 + $0xf8] sm:$0xff] }
  0x2e   :  { %v83_v30 = vadd.f32 %v82_v24, %v69_v26  ;;  %v1648_v32 = vpop.eup %1647  ;;  %v187_v24 = vld [vmem:[%s2411_s4 + $0xe8] sm:$0xff]  ;;  %v1678_v26 = vmov 2  }
  0x2f   :  { %v124_v35 = vmul.f32 %v1648_v32, %v123_v31  ;;  %239 = vperm.xlu0 %1607, %v1851_v28   ;;  %244 = vperm.xlu1 %1608, %v1856_v29  }
  0x30   :  { %v97_v34 = vadd.f32 %v96_v27, %v83_v30  ;;  %v1650_v39 = vpop.eup %1649 }
  0x31   :  { %v137_v42 = vmul.f32 %v1650_v39, %v136_v33 }
  0x32   :  { %v1652_v41 = vpop.eup %1651  ;;  %v99_v44 = vadd.f32 %v98_v40, %v97_v34 }
  0x33   :  { %v151_v43 = vmul.f32 %v1652_v41, %v150_v36  ;;  %v138_v45 = vadd.f32 %v137_v42, %v124_v35  ;;  %249 = vperm.xlu0 %1607, %v1866_v37   ;;  %254 = vperm.xlu1 %1608, %v1871_v38  }
  0x34   :  { %1653 = vtanh.f32 %v99_v44  ;;  %v1679_v44 = vmov 3  }
  0x35   :  { %v152_v47 = vadd.f32 %v151_v43, %v138_v45 }
  0x37   :  { %v154_v50 = vadd.f32 %v153_v46, %v152_v47  ;;  %259 = vperm.xlu0 %1607, %v1882_v48   ;;  %264 = vperm.xlu1 %1608, %v1887_v49  }
  0x39   :  { %1655 = vtanh.f32 %v154_v50 }
  0x3b   :  { %269 = vperm.xlu0 %1607, %v1894_v51   ;;  %274 = vperm.xlu1 %1608, %v1899_v52  }
  0x3e   :  { %v1654_v55 = vpop.eup %1653 }
  0x3f   :  { %279 = vperm.xlu0 %1607, %v1906_v53   ;;  %284 = vperm.xlu1 %1608, %v1911_v54  }
  0x43   :  { %v1656_v56 = vpop.eup %1655  ;;  %1610 = vset.pattern.permute.xlu1 %v1677_v1  ;;  %1609 = vset.pattern.permute.xlu0 %v1677_v1 }
  0x44   :  { %v1461_v57 = vpack.c.bf16 %v1656_v56, %v1654_v55  ;;  %526 = vperm.xlu1 %1610, %v1823_v13   ;;  %522 = vperm.xlu0 %1609, %v1803_v5  }
  0x46   :  { %1520 = vmatprep.subr.msk.bf16.mxu0 %vm1460_vm3, %v1461_v57 }
  0x47   :  { %1521 = vmatpush3.bf16.msk.msra.mxu0 %vm1460_vm3, %v1461_v57 }
  0x48   :  { %530 = vperm.xlu1 %1610, %v1808_v6   ;;  %534 = vperm.xlu0 %1609, %v1828_v14  }
  0x4a   :  { %1523 = vmatmul.mubr.msk.bf16.vlgmr.msra.gmra.mrb[0].mxu0 %vm327_vm0, %v1616_v58 }
  0x4b   :  { %1526 = vmatprep.mubr.msk.bf16.mxu0 %vm327_vm0, %v1617_v59 }
  0x4c   :  { %538 = vperm.xlu1 %1610, %v1838_v19   ;;  %542 = vperm.xlu0 %1609, %v1843_v20  }
  0x50   :  { %546 = vperm.xlu1 %1610, %v1851_v28   ;;  %550 = vperm.xlu0 %1609, %v1856_v29  }
  0x52   :  { %1527 = vmatmul.mubr.msk.bf16.gmra.mrb[4].mxu0 %vm327_vm0, %v1618_v60 }
  0x53   :  { %1530 = vmatprep.mubr.msk.bf16.mxu0 %vm327_vm0, %v1619_v61 }
  0x54   :  { %554 = vperm.xlu1 %1610, %v1866_v37   ;;  %558 = vperm.xlu0 %1609, %v1871_v38  }
  0x58   :  { %562 = vperm.xlu1 %1610, %v1882_v48   ;;  %566 = vperm.xlu0 %1609, %v1887_v49  }
  0x5a   :  { %1531 = vmatmul.mubr.msk.bf16.gmra.mrb[8].mxu0 %vm327_vm0, %v1620_v62 }
  0x5b   :  { %1534 = vmatprep.mubr.msk.bf16.mxu0 %vm327_vm0, %v1621_v63 }
  0x5c   :  { %570 = vperm.xlu1 %1610, %v1894_v51   ;;  %574 = vperm.xlu0 %1609, %v1899_v52  }
  0x60   :  { %578 = vperm.xlu1 %1610, %v1906_v53   ;;  %582 = vperm.xlu0 %1609, %v1911_v54  }
  0x62   :  { %1535 = vmatmul.mubr.msk.bf16.gmra.mrb[12].mxu0 %vm327_vm0, %v1622_v0 }
  0x63   :  { %1554 = vmatprep.mubr.bf16.mxu0 %v1623_v2 }
  0x64   :  { %587 = vperm.xlu1 %1610, %v174_v4   ;;  %592 = vperm.xlu0 %1609, %v175_v8  }
  0x68   :  { %597 = vperm.xlu1 %1610, %v176_v7   ;;  %602 = vperm.xlu0 %1609, %v177_v10  }
  0x6c   :  { %607 = vperm.xlu1 %1610, %v178_v9   ;;  %612 = vperm.xlu0 %1609, %v179_v12  }
  0x70   :  { %617 = vperm.xlu1 %1610, %v180_v11   ;;  %622 = vperm.xlu0 %1609, %v181_v16  }
  0x74   :  { %627 = vperm.xlu1 %1610, %v182_v15   ;;  %632 = vperm.xlu0 %1609, %v183_v18  }
  0x78   :  { %637 = vperm.xlu1 %1610, %v184_v17   ;;  %642 = vperm.xlu0 %1609, %v185_v22  }
  0x7c   :  { %647 = vperm.xlu1 %1610, %v186_v21   ;;  %652 = vperm.xlu0 %1609, %v187_v24  }
  0x80   :  { %657 = vperm.xlu1 %1610, %v188_v23   ;;  %662 = vperm.xlu0 %1609, %v189_v25  }
  0x84   :  { %1611 = vset.pattern.permute.xlu1 %v1678_v26  ;;  %1612 = vset.pattern.permute.xlu0 %v1678_v26 }
  0x85   :  { %1098 = vperm.xlu1 %1611, %v1803_v5   ;;  %1102 = vperm.xlu0 %1612, %v1823_v13  }
  0x89   :  { %1106 = vperm.xlu1 %1611, %v1808_v6   ;;  %1114 = vperm.xlu0 %1612, %v1838_v19  }
  0x8d   :  { %1110 = vperm.xlu1 %1611, %v1828_v14   ;;  %1122 = vperm.xlu0 %1612, %v1851_v28  }
  0x91   :  { %1118 = vperm.xlu1 %1611, %v1843_v20   ;;  %1130 = vperm.xlu0 %1612, %v1866_v37  }
  0x95   :  { %1126 = vperm.xlu1 %1611, %v1856_v29   ;;  %1138 = vperm.xlu0 %1612, %v1882_v48  }
  0x99   :  { %1134 = vperm.xlu1 %1611, %v1871_v38   ;;  %1146 = vperm.xlu0 %1612, %v1894_v51  }
  0x9d   :  { %1142 = vperm.xlu1 %1611, %v1887_v49   ;;  %1154 = vperm.xlu0 %1612, %v1906_v53  }
  0xa1   :  { %1150 = vperm.xlu1 %1611, %v1899_v52   ;;  %1613 = vset.pattern.permute.xlu0 %v1679_v44 }
  0xa2   :  { %v210_v27 = vpop.permute.xlu0 %209  ;;  %v220_v30 = vpop.permute.xlu1 %219  ;;  %1178 = vperm.xlu0 %1613, %v1803_v5  }
  0xa5   :  { %1158 = vperm.xlu1 %1611, %v1911_v54  }
  0xa6   :  { %v215_v31 = vpop.permute.xlu0 %214  ;;  %v225_v32 = vpop.permute.xlu1 %224  ;;  %1190 = vperm.xlu0 %1613, %v1828_v14  }
  0xa9   :  { %1614 = vset.pattern.permute.xlu1 %v1679_v44 }
  0xaa   :  { %v230_v33 = vpop.permute.xlu0 %229  ;;  %v235_v34 = vpop.permute.xlu1 %234  ;;  %1182 = vperm.xlu1 %1614, %v1823_v13   ;;  %1198 = vperm.xlu0 %1613, %v1843_v20  }
  0xae   :  { %v240_v35 = vpop.permute.xlu0 %239  ;;  %v245_v41 = vpop.permute.xlu1 %244  ;;  %1186 = vperm.xlu1 %1614, %v1808_v6   ;;  %1206 = vperm.xlu0 %1613, %v1856_v29  }
  0xb2   :  { %v250_v57 = vpop.permute.xlu0 %249  ;;  %v255_v61 = vpop.permute.xlu1 %254  ;;  %1194 = vperm.xlu1 %1614, %v1838_v19   ;;  %1214 = vperm.xlu0 %1613, %v1871_v38  }
  0xb6   :  { %v260_v13 = vpop.permute.xlu0 %259  ;;  %v265_v15 = vpop.permute.xlu1 %264  ;;  %1202 = vperm.xlu1 %1614, %v1851_v28   ;;  %1222 = vperm.xlu0 %1613, %v1887_v49  }
  0xba   :  { %v270_v25 = vpop.permute.xlu0 %269  ;;  %v275_v19 = vpop.permute.xlu1 %274  ;;  %1210 = vperm.xlu1 %1614, %v1866_v37   ;;  %1230 = vperm.xlu0 %1613, %v1899_v52  }
  0xbe   :  { %v280_v28 = vpop.permute.xlu0 %279  ;;  %1218 = vperm.xlu1 %1614, %v1882_v48   ;;  %1238 = vperm.xlu0 %1613, %v1911_v54   ;;  %v1626_v54 = vld [vmem:[%s2410_s3 + $0x38] sm:$0xff]  }
  0xc2   :  { %1226 = vperm.xlu1 %1614, %v1894_v51   ;;  %v1625_v51 = vld [vmem:[%s2410_s3 + $0x8] sm:$0xff]  }
  0xc6   :  { %1234 = vperm.xlu1 %1614, %v1906_v53   ;;  %v1627_v53 = vld [vmem:[%s2410_s3 + $0x10] sm:$0xff]  }
 0x11d   :  { %v1524_v36 = vpop.f32.mrb[0].mxu0 }
 0x11e   :  { %v395_v39 = vadd.f32 %v1524_v36, %v220_v30  ;;  %v386_v40 = vpop.f32.mrb[1].mxu0 }
 0x11f   :  { %v387_v42 = vadd.f32 %v386_v40, %v210_v27  ;;  %v1525_v43 = vpop.f32.mrb[2].mxu0 }
 0x120   :  { %v451_v45 = vmul.f32 0.01, %v395_v39  ;;  %v398_v46 = vadd.f32 %v1525_v43, %v225_v32  ;;  %v389_v47 = vpop.f32.mrb[3].mxu0 }
 0x121   :  { %v449_v50 = vmul.f32 0.01, %v387_v42  ;;  %v390_v55 = vadd.f32 %v389_v47, %v215_v31 }
 0x122   :  { %v452_v56 = vmul.f32 0.01, %v398_v46  ;;  %v467_v59 = vmax.f32 %v395_v39, %v451_v45 }
 0x123   :  { %v450_v58 = vmul.f32 0.01, %v390_v55  ;;  %v465_v62 = vmax.f32 %v387_v42, %v449_v50 }
 0x124   :  { %v468_v60 = vmax.f32 %v398_v46, %v452_v56  ;;  %v285_v46 = vpop.permute.xlu1 %284 }
 0x125   :  { %v466_v63 = vmax.f32 %v390_v55, %v450_v58  ;;  %v1528_v0 = vpop.f32.mrb[4].mxu0 }
 0x126   :  { %v514_v1 = vpack.c.bf16 %v468_v60, %v467_v59  ;;  %v411_v2 = vadd.f32 %v1528_v0, %v240_v35  ;;  %v402_v3 = vpop.f32.mrb[5].mxu0 }
 0x127   :  { %v513_v5 = vpack.c.bf16 %v466_v63, %v465_v62  ;;  %v403_v4 = vadd.f32 %v402_v3, %v230_v33  ;;  %v1529_v7 = vpop.f32.mrb[6].mxu0  ;;  %v1630_v3 = vld [vmem:[%s2410_s3 + $0x48] sm:$0xff]  }
 0x128   :  { %v455_v8 = vmul.f32 0.01, %v411_v2  ;;  %v414_v9 = vadd.f32 %v1529_v7, %v245_v41  ;;  %v405_v10 = vpop.f32.mrb[7].mxu0  ;;  %v1633_v7 = vld [vmem:[%s2410_s3 + $0x28] sm:$0xff]  }
 0x129   :  { %v453_v11 = vmul.f32 0.01, %v403_v4  ;;  %v406_v14 = vadd.f32 %v405_v10, %v235_v34  ;;  %1538 = vmatprep.subr.bf16.mxu0 %v513_v5  ;;  %1586 = vmatprep.subr.bf16.mxu1 %v513_v5  ;;  %v1636_v10 = vld [vmem:[%s2410_s3 + $0x68] sm:$0xff]  }
 0x12a   :  { %v456_v12 = vmul.f32 0.01, %v414_v9  ;;  %1539 = vmatpush3.bf16.msra.mxu0 %v513_v5  ;;  %1594 = vmatpush3.bf16.msra.mxu1 %v513_v5  ;;  %v471_v17 = vmax.f32 %v411_v2, %v455_v8  ;;  %v1629_v2 = vld [vmem:[%s2410_s3 + $0x18] sm:$0xff]   ;;  %v1631_v5 = vld [vmem:[%s2410_s3 + $0x20] sm:$0xff]  }
 0x12b   :  { %v454_v16 = vmul.f32 0.01, %v406_v14  ;;  %1540 = vmatprep.subr.bf16.mxu0 %v514_v1  ;;  %1587 = vmatprep.subr.bf16.mxu1 %v514_v1  ;;  %v469_v6 = vmax.f32 %v403_v4, %v453_v11  ;;  %v1632_v4 = vld [vmem:[%s2410_s3 + $0x50] sm:$0xff]   ;;  %v1634_v8 = vld [vmem:[%s2410_s3 + $0x58] sm:$0xff]  }
 0x12c   :  { %v472_v18 = vmax.f32 %v414_v9, %v456_v12  ;;  %v1635_v9 = vld [vmem:[%s2410_s3 + $0x60] sm:$0xff]   ;;  %v1638_v11 = vld [vmem:[%s2410_s3 + $0x78] sm:$0xff]   ;;  %v523_v12 = vpop.permute.xlu0 %522 }
 0x12d   :  { %v470_v20 = vmax.f32 %v406_v14, %v454_v16  ;;  %v1532_v21 = vpop.f32.mrb[8].mxu0  ;;  %v527_v14 = vpop.permute.xlu1 %526 }
 0x12e   :  { %v516_v22 = vpack.c.bf16 %v472_v18, %v471_v17  ;;  %v427_v23 = vadd.f32 %v1532_v21, %v260_v13  ;;  %v418_v24 = vpop.f32.mrb[9].mxu0  ;;  %1541 = vmatpush3.bf16.msra.mxu0 %v514_v1  ;;  %1595 = vmatpush3.bf16.msra.mxu1 %v514_v1  ;;  %v1628_v1 = vld [vmem:[%s2410_s3 + $0x40] sm:$0xff]   ;;  %v1637_v13 = vld [vmem:[%s2410_s3 + $0x70] sm:$0xff]  }
 0x12f   :  { %v515_v26 = vpack.c.bf16 %v470_v20, %v469_v6  ;;  %v419_v27 = vadd.f32 %v418_v24, %v250_v57  ;;  %v1533_v30 = vpop.f32.mrb[10].mxu0 }
 0x130   :  { %v459_v31 = vmul.f32 0.01, %v427_v23  ;;  %v430_v32 = vadd.f32 %v1533_v30, %v265_v15  ;;  %v421_v33 = vpop.f32.mrb[11].mxu0  ;;  %v535_v16 = vpop.permute.xlu0 %534 }
 0x131   :  { %v457_v29 = vmul.f32 0.01, %v419_v27  ;;  %v422_v34 = vadd.f32 %v421_v33, %v255_v61  ;;  %1542 = vmatprep.subr.bf16.mxu0 %v515_v26  ;;  %1588 = vmatprep.subr.bf16.mxu1 %v515_v26  ;;  %v531_v15 = vpop.permute.xlu1 %530 }
 0x132   :  { %v460_v35 = vmul.f32 0.01, %v430_v32  ;;  %1543 = vmatpush3.bf16.msra.mxu0 %v515_v26  ;;  %1596 = vmatpush3.bf16.msra.mxu1 %v515_v26  ;;  %v475_v39 = vmax.f32 %v427_v23, %v459_v31 }
 0x133   :  { %v458_v36 = vmul.f32 0.01, %v422_v34  ;;  %1544 = vmatprep.subr.bf16.mxu0 %v516_v22  ;;  %1589 = vmatprep.subr.bf16.mxu1 %v516_v22  ;;  %v473_v41 = vmax.f32 %v419_v27, %v457_v29 }
 0x134   :  { %v476_v40 = vmax.f32 %v430_v32, %v460_v35  ;;  %v543_v18 = vpop.permute.xlu0 %542 }
 0x135   :  { %v474_v38 = vmax.f32 %v422_v34, %v458_v36  ;;  %v1536_v42 = vpop.f32.mrb[12].mxu0  ;;  %v539_v17 = vpop.permute.xlu1 %538 }
 0x136   :  { %v518_v43 = vpack.c.bf16 %v476_v40, %v475_v39  ;;  %v443_v44 = vadd.f32 %v1536_v42, %v280_v28  ;;  %v434_v45 = vpop.f32.mrb[13].mxu0  ;;  %1545 = vmatpush3.bf16.msra.mxu0 %v516_v22  ;;  %1597 = vmatpush3.bf16.msra.mxu1 %v516_v22 }
 0x137   :  { %v517_v47 = vpack.c.bf16 %v474_v38, %v473_v41  ;;  %v435_v50 = vadd.f32 %v434_v45, %v270_v25  ;;  %v1537_v55 = vpop.f32.mrb[14].mxu0 }
 0x138   :  { %v463_v56 = vmul.f32 0.01, %v443_v44  ;;  %v446_v57 = vadd.f32 %v1537_v55, %v285_v46  ;;  %v437_v58 = vpop.f32.mrb[15].mxu0  ;;  %v551_v20 = vpop.permute.xlu0 %550 }
 0x139   :  { %v461_v37 = vmul.f32 0.01, %v435_v50  ;;  %v438_v49 = vadd.f32 %v437_v58, %v275_v19  ;;  %1546 = vmatprep.subr.bf16.mxu0 %v517_v47  ;;  %1590 = vmatprep.subr.bf16.mxu1 %v517_v47  ;;  %v547_v6 = vpop.permute.xlu1 %546 }
 0x13a   :  { %v464_v59 = vmul.f32 0.01, %v446_v57  ;;  %1547 = vmatpush3.bf16.msra.mxu0 %v517_v47  ;;  %1598 = vmatpush3.bf16.msra.mxu1 %v517_v47  ;;  %v479_v61 = vmax.f32 %v443_v44, %v463_v56 }
 0x13b   :  { %v462_v60 = vmul.f32 0.01, %v438_v49  ;;  %1548 = vmatprep.subr.bf16.mxu0 %v518_v43  ;;  %1591 = vmatprep.subr.bf16.mxu1 %v518_v43  ;;  %v477_v63 = vmax.f32 %v435_v50, %v461_v37 }
 0x13c   :  { %v480_v62 = vmax.f32 %v446_v57, %v464_v59  ;;  %v2089_v22 = vpop.permute.xlu0 %558 }
 0x13d   :  { %v478_v48 = vmax.f32 %v438_v49, %v462_v60  ;;  %v2087_v21 = vpop.permute.xlu1 %554 }
 0x13e   :  { %v520_v0 = vpack.c.bf16 %v480_v62, %v479_v61  ;;  %1549 = vmatpush3.bf16.msra.mxu0 %v518_v43  ;;  %1599 = vmatpush3.bf16.msra.mxu1 %v518_v43 }
 0x13f   :  { %v519_v52 = vpack.c.bf16 %v478_v48, %v477_v63 }
 0x140   :  { %v2093_v24 = vpop.permute.xlu0 %566 }
 0x141   :  { %1550 = vmatprep.subr.bf16.mxu0 %v519_v52  ;;  %1592 = vmatprep.subr.bf16.mxu1 %v519_v52  ;;  %v2091_v23 = vpop.permute.xlu1 %562 }
 0x142   :  { %1551 = vmatpush3.bf16.msra.mxu0 %v519_v52  ;;  %1600 = vmatpush3.bf16.msra.mxu1 %v519_v52 }
 0x143   :  { %1552 = vmatprep.subr.bf16.mxu0 %v520_v0  ;;  %1593 = vmatprep.subr.bf16.mxu1 %v520_v0 }
 0x144   :  { %v2097_v26 = vpop.permute.xlu0 %574 }
 0x145   :  { %v2095_v25 = vpop.permute.xlu1 %570 }
 0x146   :  { %1553 = vmatpush3.bf16.msra.mxu0 %v520_v0  ;;  %1601 = vmatpush3.bf16.msra.mxu1 %v520_v0 }
 0x148   :  { %v2101_v30 = vpop.permute.xlu0 %582 }
 0x149   :  { %1555 = vmatmul.mubr.bf16.vlgmr.msra.gmra.mrb[16].mxu0 %v1625_v51  ;;  %1567 = vmatmul.mubr.bf16.vlgmr.msra.gmra.mrb[0].mxu1 %v1626_v54  ;;  %v2099_v27 = vpop.permute.xlu1 %578 }
 0x14a   :  { %1558 = vmatprep.mubr.bf16.mxu0 %v1627_v53  ;;  %1570 = vmatprep.mubr.bf16.mxu1 %v1628_v1 }
 0x14c   :  { %v593_v32 = vpop.permute.xlu0 %592 }
 0x14d   :  { %v588_v31 = vpop.permute.xlu1 %587 }
 0x150   :  { %v603_v19 = vpop.permute.xlu0 %602 }
 0x151   :  { %1559 = vmatmul.mubr.bf16.gmra.mrb[20].mxu0 %v1629_v2  ;;  %1571 = vmatmul.mubr.bf16.gmra.mrb[4].mxu1 %v1630_v3  ;;  %v598_v33 = vpop.permute.xlu1 %597 }
 0x152   :  { %1562 = vmatprep.mubr.bf16.mxu0 %v1631_v5  ;;  %1574 = vmatprep.mubr.bf16.mxu1 %v1632_v4 }
 0x154   :  { %v2103_v34 = vpop.permute.xlu0 %612 }
 0x155   :  { %v608_v29 = vpop.permute.xlu1 %607 }
 0x158   :  { %v2107_v36 = vpop.permute.xlu0 %622 }
 0x159   :  { %1563 = vmatmul.mubr.bf16.gmra.mrb[24].mxu0 %v1633_v7  ;;  %1575 = vmatmul.mubr.bf16.gmra.mrb[8].mxu1 %v1634_v8  ;;  %v2105_v35 = vpop.permute.xlu1 %617 }
 0x15a   :  { %1578 = vmatprep.mubr.bf16.mxu1 %v1635_v9 }
 0x15c   :  { %v2111_v40 = vpop.permute.xlu0 %632 }
 0x15d   :  { %v2109_v39 = vpop.permute.xlu1 %627 }
 0x160   :  { %v2115_v41 = vpop.permute.xlu0 %642 }
 0x161   :  { %1579 = vmatmul.mubr.bf16.gmra.mrb[12].mxu1 %v1636_v10  ;;  %v2113_v28 = vpop.permute.xlu1 %637 }
 0x162   :  { %1582 = vmatprep.mubr.bf16.mxu1 %v1637_v13 }
 0x164   :  { %v2119_v42 = vpop.permute.xlu0 %652 }
 0x165   :  { %v2117_v38 = vpop.permute.xlu1 %647 }
 0x168   :  { %v2123_v44 = vpop.permute.xlu0 %662 }
 0x169   :  { %1583 = vmatmul.mubr.bf16.gmra.mrb[16].mxu1 %v1638_v11  ;;  %v2121_v43 = vpop.permute.xlu1 %657 }
 0x16c   :  { %v2143_v63 = vpop.permute.xlu0 %1102 }
 0x16d   :  { %v2125_v45 = vpop.permute.xlu1 %1098 }
 0x171   :  { %v2141_v62 = vpop.permute.xlu1 %1106 }
 0x21c   :  { %v1556_v46 = vpop.f32.mrb[16].mxu0  ;;  %v2127_v47 = vpop.f32.mrb[0].mxu1 }
 0x21d   :  { %v795_v50 = vpop.f32.mrb[17].mxu0  ;;  %v2129_v55 = vpop.f32.mrb[1].mxu1  ;;  %v804_v60 = vadd.f32 %v1556_v46, %v531_v15 }
 0x21e   :  { %v1557_v56 = vpop.f32.mrb[18].mxu0  ;;  %v2131_v57 = vpop.f32.mrb[2].mxu1  ;;  %v2135_v49 = vadd.f32 %v795_v50, %v523_v12 }
 0x21f   :  { %v798_v58 = vpop.f32.mrb[19].mxu0  ;;  %v2133_v37 = vpop.f32.mrb[3].mxu1  ;;  %v807_v48 = vadd.f32 %v1557_v56, %v535_v16 }
 0x220   :  { %v2137_v59 = vadd.f32 %v798_v58, %v527_v14  ;;  %v2151_v16 = vpop.permute.xlu1 %1110 }
 0x222   :  { %v955_v61 = vadd.f32 %v2137_v59, %v2135_v49 }
 0x224   :  { %v956_v0 = vadd.f32 %v955_v61, %v804_v60  ;;  %v1560_v52 = vpop.f32.mrb[20].mxu0  ;;  %v1572_v51 = vpop.f32.mrb[4].mxu1 }
 0x225   :  { %v811_v54 = vpop.f32.mrb[21].mxu0  ;;  %v859_v53 = vpop.f32.mrb[5].mxu1  ;;  %v820_v11 = vadd.f32 %v1560_v52, %v547_v6  ;;  %v868_v14 = vadd.f32 %v1572_v51, %v598_v33 }
 0x226   :  { %v812_v1 = vadd.f32 %v811_v54, %v539_v17  ;;  %v957_v2 = vadd.f32 %v956_v0, %v807_v48  ;;  %v1561_v3 = vpop.f32.mrb[22].mxu0  ;;  %v1573_v5 = vpop.f32.mrb[6].mxu1  ;;  %v2145_v9 = vadd.f32 %v859_v53, %v588_v31 }
 0x227   :  { %v814_v4 = vpop.f32.mrb[23].mxu0  ;;  %v862_v7 = vpop.f32.mrb[7].mxu1  ;;  %v823_v46 = vadd.f32 %v1561_v3, %v551_v20  ;;  %v871_v50 = vadd.f32 %v1573_v5, %v603_v19 }
 0x228   :  { %v958_v8 = vadd.f32 %v957_v2, %v812_v1  ;;  %v815_v10 = vadd.f32 %v814_v4, %v543_v18  ;;  %v2147_v13 = vadd.f32 %v862_v7, %v593_v32  ;;  %v2153_v17 = vpop.permute.xlu0 %1114  ;;  %v2158_v2 = vpop.permute.xlu1 %1118 }
 0x22a   :  { %v959_v12 = vadd.f32 %v958_v8, %v815_v10  ;;  %v1273_v15 = vadd.f32 %v2147_v13, %v2145_v9 }
 0x22c   :  { %v960_v56 = vadd.f32 %v959_v12, %v820_v11  ;;  %v1274_v58 = vadd.f32 %v1273_v15, %v868_v14  ;;  %v1564_v60 = vpop.f32.mrb[24].mxu0  ;;  %v1576_v31 = vpop.f32.mrb[8].mxu1 }
 0x22d   :  { %v827_v61 = vpop.f32.mrb[25].mxu0  ;;  %v875_v18 = vpop.f32.mrb[9].mxu1  ;;  %v836_v3 = vadd.f32 %v1564_v60, %v2091_v23  ;;  %v884_v5 = vadd.f32 %v1576_v31, %v2105_v35  ;;  %v852_v60 = vadd.f32 %v2127_v47, %v2099_v27 }
 0x22e   :  { %v828_v32 = vadd.f32 %v827_v61, %v2087_v21  ;;  %v961_v6 = vadd.f32 %v960_v56, %v823_v46  ;;  %v876_v33 = vadd.f32 %v875_v18, %v608_v29  ;;  %v1275_v48 = vadd.f32 %v1274_v58, %v871_v50  ;;  %v1565_v0 = vpop.f32.mrb[26].mxu0  ;;  %v1577_v52 = vpop.f32.mrb[10].mxu1 }
 0x22f   :  { %v830_v51 = vpop.f32.mrb[27].mxu0  ;;  %v878_v54 = vpop.f32.mrb[11].mxu1  ;;  %v839_v29 = vadd.f32 %v1565_v0, %v2093_v24  ;;  %v887_v7 = vadd.f32 %v1577_v52, %v2107_v36  ;;  %v847_v24 = vadd.f32 %v2133_v37, %v2097_v26  ;;  %v855_v61 = vadd.f32 %v2131_v57, %v2101_v30 }
 0x230   :  { %v962_v53 = vadd.f32 %v961_v6, %v828_v32  ;;  %v1276_v1 = vadd.f32 %v1275_v48, %v876_v33  ;;  %v831_v20 = vadd.f32 %v830_v51, %v2089_v22  ;;  %v879_v19 = vadd.f32 %v878_v54, %v2103_v34  ;;  %v2164_v14 = vpop.permute.xlu0 %1122  ;;  %v2169_v46 = vpop.permute.xlu1 %1126 }
 0x231   :  { %v844_v34 = vadd.f32 %v2129_v55, %v2095_v25 }
 0x232   :  { %v963_v21 = vadd.f32 %v962_v53, %v831_v20  ;;  %v1277_v4 = vadd.f32 %v1276_v1, %v879_v19 }
 0x234   :  { %v964_v8 = vadd.f32 %v963_v21, %v836_v3  ;;  %v1278_v10 = vadd.f32 %v1277_v4, %v884_v5  ;;  %v1580_v11 = vpop.f32.mrb[12].mxu1  ;;  %v2182_v6 = vpop.permute.xlu1 %1134 }
 0x235   :  { %v891_v22 = vpop.f32.mrb[13].mxu1  ;;  %v900_v25 = vadd.f32 %v1580_v11, %v2113_v28 }
 0x236   :  { %v965_v12 = vadd.f32 %v964_v8, %v839_v29  ;;  %v892_v23 = vadd.f32 %v891_v22, %v2109_v39  ;;  %v1279_v15 = vadd.f32 %v1278_v10, %v887_v7  ;;  %v1581_v35 = vpop.f32.mrb[14].mxu1  ;;  %v2177_v39 = vpop.permute.xlu0 %1130 }
 0x237   :  { %v894_v50 = vpop.f32.mrb[15].mxu1  ;;  %v903_v32 = vadd.f32 %v1581_v35, %v2115_v41 }
 0x238   :  { %v966_v36 = vadd.f32 %v965_v12, %v844_v34  ;;  %v1280_v56 = vadd.f32 %v1279_v15, %v892_v23  ;;  %v895_v58 = vadd.f32 %v894_v50, %v2111_v40  ;;  %v2189_v53 = vpop.permute.xlu1 %1142 }
 0x23a   :  { %v967_v31 = vadd.f32 %v966_v36, %v847_v24  ;;  %v1281_v55 = vadd.f32 %v1280_v56, %v895_v58  ;;  %v2186_v54 = vpop.permute.xlu0 %1138 }
 0x23c   :  { %v968_v18 = vadd.f32 %v967_v31, %v852_v60  ;;  %v1282_v26 = vadd.f32 %v1281_v55, %v900_v25  ;;  %v1584_v37 = vpop.f32.mrb[16].mxu1  ;;  %v2194_v29 = vpop.permute.xlu1 %1150 }
 0x23d   :  { %v907_v40 = vpop.f32.mrb[17].mxu1  ;;  %v916_v41 = vadd.f32 %v1584_v37, %v2121_v43 }
 0x23e   :  { %v969_v33 = vadd.f32 %v968_v18, %v855_v61  ;;  %v908_v27 = vadd.f32 %v907_v40, %v2117_v38  ;;  %v1283_v47 = vadd.f32 %v1282_v26, %v903_v32  ;;  %v1585_v48 = vpop.f32.mrb[18].mxu1  ;;  %v2192_v5 = vpop.permute.xlu0 %1146 }
 0x23f   :  { %v910_v28 = vpop.f32.mrb[19].mxu1  ;;  %v919_v20 = vadd.f32 %v1585_v48, %v2123_v44 }
 0x240   :  { %v970_v0 = vrot.slane %v969_v33, 4  ;;  %v1284_v52 = vadd.f32 %v1283_v47, %v908_v27  ;;  %v911_v51 = vadd.f32 %v910_v28, %v2119_v42  ;;  %v2200_v34 = vpop.permute.xlu1 %1158 }
 0x242   :  { %v971_v30 = vadd.f32 %v970_v0, %v969_v33  ;;  %v1285_v57 = vadd.f32 %v1284_v52, %v911_v51  ;;  %v2196_v43 = vpop.permute.xlu0 %1154 }
 0x244   :  { %v972_v1 = vrot.slane %v971_v30, 2  ;;  %v1286_v19 = vadd.f32 %v1285_v57, %v916_v41  ;;  %v2202_v24 = vpop.permute.xlu1 %1182 }
 0x246   :  { %v973_v38 = vadd.f32 %v972_v1, %v971_v30  ;;  %v1287_v3 = vadd.f32 %v1286_v19, %v919_v20  ;;  %v2204_v36 = vpop.permute.xlu0 %1178 }
 0x248   :  { %v974_v21 = vrot.slane %v973_v38, 1  ;;  %v1288_v4 = vrot.slane %v1287_v3, 4  ;;  %v2212_v61 = vpop.permute.xlu1 %1186 }
 0x24a   :  { %v975_v42 = vadd.f32 %v974_v21, %v973_v38  ;;  %v1289_v7 = vadd.f32 %v1288_v4, %v1287_v3  ;;  %v2214_v18 = vpop.permute.xlu0 %1190 }
 0x24c   :  { %v976_v8 = vmul.f32 0.0625, %v975_v42  ;;  %v1290_v10 = vrot.slane %v1289_v7, 2  ;;  %v2216_v47 = vpop.permute.xlu1 %1194 }
 0x24e   :  { %v977_v11 = vsub.f32 %v2135_v49, %v976_v8  ;;  %v978_v22 = vsub.f32 %v2137_v59, %v976_v8  ;;  %v1291_v44 = vadd.f32 %v1290_v10, %v1289_v7 }
 0x250   :  { %v1041_v12 = vmul.f32 %v977_v11, %v977_v11  ;;  %v1042_v23 = vmul.f32 %v978_v22, %v978_v22  ;;  %v1292_v15 = vrot.slane %v1291_v44, 1  ;;  %v2220_v51 = vpop.permute.xlu1 %1202 }
 0x252   :  { %v1057_v35 = vadd.f32 %v1042_v23, %v1041_v12  ;;  %v1293_v50 = vadd.f32 %v1292_v15, %v1291_v44 }
 0x254   :  { %v1072_v56 = vrot.slane %v1057_v35, 4  ;;  %v1294_v58 = vmul.f32 0.0625, %v1293_v50  ;;  %v2224_v20 = vpop.permute.xlu1 %1210 }
 0x256   :  { %v1073_v60 = vadd.f32 %v1072_v56, %v1057_v35  ;;  %v2207_v31 = vsub.f32 %v2145_v9, %v1294_v58  ;;  %v1296_v49 = vsub.f32 %v2147_v13, %v1294_v58  ;;  %v2218_v9 = vpop.permute.xlu0 %1198 }
 0x258   :  { %v1074_v59 = vrot.slane %v1073_v60, 2  ;;  %v1327_v25 = vmul.f32 %v2207_v31, %v2207_v31  ;;  %v1328_v55 = vmul.f32 %v1296_v49, %v1296_v49  ;;  %v2232_v44 = vpop.permute.xlu1 %1218 }
 0x25a   :  { %v1075_v32 = vadd.f32 %v1074_v59, %v1073_v60  ;;  %v1343_v26 = vadd.f32 %v1328_v55, %v1327_v25  ;;  %v2222_v30 = vpop.permute.xlu0 %1206 }
 0x25c   :  { %v1076_v37 = vrot.slane %v1075_v32, 1  ;;  %v1358_v40 = vrot.slane %v1343_v26, 4 }
 0x25e   :  { %v1077_v33 = vadd.f32 %v1076_v37, %v1075_v32  ;;  %v1359_v27 = vadd.f32 %v1358_v40, %v1343_v26  ;;  %v2226_v19 = vpop.permute.xlu0 %1214 }
 0x260   :  { %v1078_v13 = vmul.f32 0.0625, %v1077_v33  ;;  %v1360_v48 = vrot.slane %v1359_v27, 2 }
 0x262   :  { %v1079_v28 = vadd.f32 1e-05, %v1078_v13  ;;  %v1361_v0 = vadd.f32 %v1360_v48, %v1359_v27  ;;  %v2234_v12 = vpop.permute.xlu0 %1222 }
 0x264   :  { %1657 = vrsqrt.f32 %v1079_v28  ;;  %v1362_v52 = vrot.slane %v1361_v0, 1 }
 0x266   :  { %v1363_v41 = vadd.f32 %v1362_v52, %v1361_v0 }
 0x268   :  { %v1364_v57 = vmul.f32 0.0625, %v1363_v41 }
 0x26a   :  { %v1365_v1 = vadd.f32 1e-05, %v1364_v57  ;;  %v1227_v57 = vpop.permute.xlu1 %1226 }
 0x26c   :  { %1659 = vrsqrt.f32 %v1365_v1  ;;  %v1231_v1 = vpop.permute.xlu0 %1230 }
 0x26e   :  { %v1658_v38 = vpop.eup %1657 }
 0x26f   :  { %v1083_v3 = vmul.f32 0.0, %v1658_v38  ;;  %v1082_v21 = vmul.f32 %v1658_v38, %v978_v22  ;;  %v1081_v4 = vmul.f32 %v1658_v38, %v977_v11 }
 0x271   :  { %v1172_v42 = vmul.f32 %v2189_v53, %v1083_v3  ;;  %v1169_v7 = vmul.f32 %v2177_v39, %v1083_v3  ;;  %v1174_v8 = vmul.f32 %v2194_v29, %v1083_v3  ;;  %v1171_v10 = vmul.f32 %v2186_v54, %v1083_v3 }
 0x272   :  { %v2237_v23 = vmul.f32 %v2200_v34, %v1083_v3  ;;  %v1173_v15 = vmul.f32 %v2192_v5, %v1083_v3  ;;  %v2241_v22 = vmul.f32 %v2196_v43, %v1083_v3  ;;  %v1162_v11 = vmul.f32 %v2143_v63, %v1082_v21 }
 0x273   :  { %v1161_v35 = vmul.f32 %v2125_v45, %v1081_v4  ;;  %v1163_v50 = vmul.f32 %v2141_v62, %v1083_v3  ;;  %v1164_v56 = vmul.f32 %v2151_v16, %v1083_v3  ;;  %v1165_v58 = vmul.f32 %v2153_v17, %v1083_v3 }
 0x274   :  { %v1242_v60 = vadd.f32 %v2202_v24, %v1162_v11  ;;  %v1166_v59 = vmul.f32 %v2158_v2, %v1083_v3  ;;  %v1167_v25 = vmul.f32 %v2164_v14, %v1083_v3  ;;  %v1168_v55 = vmul.f32 %v2169_v46, %v1083_v3 }
 0x275   :  { %v1241_v32 = vadd.f32 %v2204_v36, %v1161_v35  ;;  %v1243_v26 = vadd.f32 %v2212_v61, %v1163_v50  ;;  %v1244_v37 = vadd.f32 %v2214_v18, %v1164_v56  ;;  %v1245_v40 = vadd.f32 %v2216_v47, %v1165_v58  ;;  %v1239_v56 = vpop.permute.xlu0 %1238 }
 0x276   :  { %v1660_v33 = vpop.eup %1659  ;;  %1258 = vst [vmem:[%s2412_s5 + $0x8] sm:$0xff] %v1242_v60  ;;  %v1246_v27 = vadd.f32 %v2218_v9, %v1166_v59  ;;  %v1247_v13 = vadd.f32 %v2220_v51, %v1167_v25  ;;  %v1248_v48 = vadd.f32 %v2222_v30, %v1168_v55  ;;  %v1249_v28 = vadd.f32 %v2224_v20, %v1169_v7 }
 0x277   :  { %v2263_v0 = vmul.f32 0.0, %v1660_v33  ;;  %v1368_v52 = vmul.f32 %v1660_v33, %v1296_v49  ;;  %1257 = vst [vmem:[%s2412_s5] sm:$0xff] %v1241_v32  ;;  %v1367_v41 = vmul.f32 %v1660_v33, %v2207_v31  ;;  %1259 = vst [vmem:[%s2412_s5 + $0x10] sm:$0xff] %v1243_v26  ;;  %v1170_v49 = vmul.f32 %v2182_v6, %v1083_v3 }
 0x278   :  { %1260 = vst [vmem:[%s2412_s5 + $0x18] sm:$0xff] %v1244_v37  ;;  %1261 = vst [vmem:[%s2412_s5 + $0x20] sm:$0xff] %v1245_v40  ;;  %v1251_v31 = vadd.f32 %v2232_v44, %v1171_v10  ;;  %v1252_v38 = vadd.f32 %v2234_v12, %v1172_v42  ;;  %v1253_v3 = vadd.f32 %v1227_v57, %v1173_v15 }
 0x279   :  { %1262 = vst [vmem:[%s2412_s5 + $0x28] sm:$0xff] %v1246_v27  ;;  %1263 = vst [vmem:[%s2412_s5 + $0x30] sm:$0xff] %v1247_v13  ;;  %v1254_v21 = vadd.f32 %v1231_v1, %v1174_v8  ;;  %v1384_v4 = vmul.f32 %v1368_v52, %v2143_v63  ;;  %v1383_v7 = vmul.f32 %v1367_v41, %v2125_v45 }
 0x27a   :  { %1264 = vst [vmem:[%s2412_s5 + $0x38] sm:$0xff] %v1248_v48  ;;  %1265 = vst [vmem:[%s2412_s5 + $0x40] sm:$0xff] %v1249_v28  ;;  %v1385_v11 = vmul.f32 %v2263_v0, %v2141_v62  ;;  %v1386_v35 = vmul.f32 %v2263_v0, %v2151_v16  ;;  %v1387_v50 = vmul.f32 %v2263_v0, %v2153_v17 }
 0x27b   :  { %v1388_v10 = vmul.f32 %v2263_v0, %v2158_v2  ;;  %v1389_v42 = vmul.f32 %v2263_v0, %v2164_v14  ;;  %v1390_v63 = vmul.f32 %v2263_v0, %v2169_v46  ;;  %1267 = vst [vmem:[%s2412_s5 + $0x50] sm:$0xff] %v1251_v31  ;;  %1268 = vst [vmem:[%s2412_s5 + $0x58] sm:$0xff] %v1252_v38 }
 0x27c   :  { %1269 = vst [vmem:[%s2412_s5 + $0x60] sm:$0xff] %v1253_v3  ;;  %1270 = vst [vmem:[%s2412_s5 + $0x68] sm:$0xff] %v1254_v21  ;;  %v1400_v45 = vadd.f32 %v1384_v4, %v2202_v24  ;;  %v1399_v62 = vadd.f32 %v1383_v7, %v2204_v36  ;;  %v1401_v16 = vadd.f32 %v1385_v11, %v2212_v61 }
 0x27d   :  { %v1402_v17 = vadd.f32 %v1386_v35, %v2214_v18  ;;  %v1403_v2 = vadd.f32 %v1387_v50, %v2216_v47  ;;  %v1404_v14 = vadd.f32 %v1388_v10, %v2218_v9  ;;  %v1405_v46 = vadd.f32 %v1389_v42, %v2220_v51  ;;  %v1235_v47 = vpop.permute.xlu1 %1234 }
 0x27e   :  { %v1406_v8 = vadd.f32 %v1390_v63, %v2222_v30  ;;  %1416 = vst [vmem:[%s2412_s5 + $0x88] sm:$0xff] %v1400_v45  ;;  %1415 = vst [vmem:[%s2412_s5 + $0x80] sm:$0xff] %v1399_v62  ;;  %v1391_v24 = vmul.f32 %v2263_v0, %v2177_v39  ;;  %v1250_v36 = vadd.f32 %v2226_v19, %v1170_v49 }
 0x27f   :  { %1417 = vst [vmem:[%s2412_s5 + $0x90] sm:$0xff] %v1401_v16  ;;  %1418 = vst [vmem:[%s2412_s5 + $0x98] sm:$0xff] %v1402_v17  ;;  %v1392_v61 = vmul.f32 %v2263_v0, %v2182_v6  ;;  %v1393_v18 = vmul.f32 %v2263_v0, %v2186_v54  ;;  %v1394_v39 = vmul.f32 %v2263_v0, %v2189_v53 }
 0x280   :  { %1419 = vst [vmem:[%s2412_s5 + $0xa0] sm:$0xff] %v1403_v2  ;;  %1420 = vst [vmem:[%s2412_s5 + $0xa8] sm:$0xff] %v1404_v14  ;;  %v1395_v6 = vmul.f32 %v2263_v0, %v2192_v5  ;;  %v1396_v54 = vmul.f32 %v2263_v0, %v2194_v29  ;;  %v1255_v9 = vadd.f32 %v1235_v47, %v2241_v22 }
 0x281   :  { %1421 = vst [vmem:[%s2412_s5 + $0xb0] sm:$0xff] %v1405_v46  ;;  %1422 = vst [vmem:[%s2412_s5 + $0xb8] sm:$0xff] %v1406_v8  ;;  %v1407_v51 = vadd.f32 %v1391_v24, %v2224_v20  ;;  %v1408_v30 = vadd.f32 %v1392_v61, %v2226_v19  ;;  %v1409_v15 = vadd.f32 %v1393_v18, %v2232_v44 }
 0x282   :  { %1266 = vst [vmem:[%s2412_s5 + $0x48] sm:$0xff] %v1250_v36  ;;  %v1397_v53 = vmul.f32 %v2263_v0, %v2196_v43  ;;  %v1410_v5 = vadd.f32 %v1394_v39, %v2234_v12  ;;  %v1411_v58 = vadd.f32 %v1395_v6, %v1227_v57  ;;  %v1412_v29 = vadd.f32 %v1396_v54, %v1231_v1 }
 0x283   :  { %1271 = vst [vmem:[%s2412_s5 + $0x70] sm:$0xff] %v1255_v9  ;;  %v1256_v20 = vadd.f32 %v1239_v56, %v2237_v23  ;;  %1423 = vst [vmem:[%s2412_s5 + $0xc0] sm:$0xff] %v1407_v51  ;;  %v1398_v19 = vmul.f32 %v2263_v0, %v2200_v34 }
 0x284   :  { %1424 = vst [vmem:[%s2412_s5 + $0xc8] sm:$0xff] %v1408_v30  ;;  %1425 = vst [vmem:[%s2412_s5 + $0xd0] sm:$0xff] %v1409_v15  ;;  %v1413_v43 = vadd.f32 %v1397_v53, %v1235_v47 }
 0x285   :  { %1426 = vst [vmem:[%s2412_s5 + $0xd8] sm:$0xff] %v1410_v5  ;;  %1427 = vst [vmem:[%s2412_s5 + $0xe0] sm:$0xff] %v1411_v58  ;;  %v1414_v34 = vadd.f32 %v1398_v19, %v1239_v56 }
 0x286   :  { %1428 = vst [vmem:[%s2412_s5 + $0xe8] sm:$0xff] %v1412_v29  ;;  %1272 = vst [vmem:[%s2412_s5 + $0x78] sm:$0xff] %v1256_v20 }
 0x287   :  { %1429 = vst [vmem:[%s2412_s5 + $0xf0] sm:$0xff] %v1413_v43  ;;  %1430 = vst [vmem:[%s2412_s5 + $0xf8] sm:$0xff] %v1414_v34 }
 0x288   :  { %1435 = vsyncpa [#allocation3], 1 }

</bundles_post_ra>
